<compile_context>
chip_gen: v7x
topology: tpu7x:2x2x1
jax: 0.10.0
libtpu: 0.0.40
codegen_flags: <defaults>
</compile_context>

<pallas_src>
import functools

import jax
import jax.numpy as jnp
from jax.experimental import pallas as pl
from jax.experimental.pallas import tpu as pltpu


def decoder_layer_kernel(n_heads,
                         y_ref, mem_ref,
                         w_qkv_s_ref, b_qkv_s_ref, wo_s_ref, bo_s_ref,
                         wq_c_ref, bq_c_ref, w_kv_c_ref, b_kv_c_ref,
                         wo_c_ref, bo_c_ref,
                         g1_ref, be1_ref, g2_ref, be2_ref, g3_ref, be3_ref,
                         w1_ref, w2_ref,
                         out_ref, self_score_ref, cross_score_ref,
                         ctx_ref):
    f32 = jnp.float32
    _, S, D = y_ref.shape
    Sm = mem_ref.shape[1]
    H = n_heads
    dh = D // H
    scale = 1.0 / (dh ** 0.5)

    y2 = y_ref[0]       # (S, D)   current batch element
    m2 = mem_ref[0]     # (Sm, D)

    def layer_norm(h2, g_ref, b_ref):
        mu = jnp.mean(h2, axis=-1, keepdims=True)
        c = h2 - mu                                   # reuse centered value
        var = jnp.mean(c * c, axis=-1, keepdims=True)
        return c * jax.lax.rsqrt(var + 1e-5) * g_ref[...] + b_ref[...]

    def mha(q2, k2, v2, wo_ref, bo_ref, score_ref):
        # q2: (S, D), k2/v2: (Skv, D).  Fold 1/sqrt(dh) into q once.
        qs = q2 * scale
        for h in range(H):                            # H is small and static
            sl = slice(h * dh, (h + 1) * dh)
            # s[q, k] = sum_d qs[q, d] * k2[k, d]   (contract last dims, no transpose)
            s = jax.lax.dot_general(qs[:, sl], k2[:, sl],
                                    (((1,), (1,)), ((), ())),
                                    preferred_element_type=f32)      # (S, Skv)
            s = s - jnp.max(s, axis=-1, keepdims=True)
            e = jnp.exp(s)
            p = e / jnp.sum(e, axis=-1, keepdims=True)               # exact softmax
            score_ref[0, h] = p
            # Head context goes into its lane slice of the VMEM scratch: one
            # K=D output projection after the loop (no per-head accumulate).
            ctx_ref[:, sl] = jnp.dot(p, v2[:, sl], preferred_element_type=f32)
        return (jnp.dot(ctx_ref[...], wo_ref[...], preferred_element_type=f32)
                + bo_ref[...])

    # --- self attention + norm1 (fused QKV matmul) ---
    qkv = jnp.dot(y2, w_qkv_s_ref[...], preferred_element_type=f32) + b_qkv_s_ref[...]
    attn1 = mha(qkv[:, :D], qkv[:, D:2 * D], qkv[:, 2 * D:],
                wo_s_ref, bo_s_ref, self_score_ref)
    n1 = layer_norm(y2 + attn1, g1_ref, be1_ref)

    # --- cross attention + norm2 (fused KV matmul on memory) ---
    qc = jnp.dot(n1, wq_c_ref[...], preferred_element_type=f32) + bq_c_ref[...]
    kvc = jnp.dot(m2, w_kv_c_ref[...], preferred_element_type=f32) + b_kv_c_ref[...]
    attn2 = mha(qc, kvc[:, :D], kvc[:, D:], wo_c_ref, bo_c_ref, cross_score_ref)
    n2 = layer_norm(n1 + attn2, g2_ref, be2_ref)

    # --- FFN: Linear(D, d_fc, no bias) -> ReLU -> Linear(d_fc, D, no bias) ---
    h1 = jnp.maximum(jnp.dot(n2, w1_ref[...], preferred_element_type=f32), 0.0)
    ff = jnp.dot(h1, w2_ref[...], preferred_element_type=f32)
    n3 = layer_norm(n2 + ff, g3_ref, be3_ref)

    out_ref[0] = n3.astype(out_ref.dtype)


def decoder_layer(y, memory, params, n_heads):
    B, S, D = y.shape
    Sm = memory.shape[1]
    H = n_heads
    assert D % H == 0
    d_fc = params["w1"].shape[1]

    # Fuse projection weights in the wrapper (one wide matmul each inside the kernel).
    w_qkv_s = jnp.concatenate([params["wq_s"], params["wk_s"], params["wv_s"]], axis=1)
    b_qkv_s = jnp.concatenate([params["bq_s"], params["bk_s"], params["bv_s"]], axis=1)
    w_kv_c = jnp.concatenate([params["wk_c"], params["wv_c"]], axis=1)
    b_kv_c = jnp.concatenate([params["bk_c"], params["bv_c"]], axis=1)

    def const_spec(shape):
        # Constant block index across the grid -> stays VMEM-resident.
        return pl.BlockSpec(shape, lambda b: (0,) * len(shape))

    kernel = functools.partial(decoder_layer_kernel, n_heads)

    out, self_score, cross_score = pl.pallas_call(
        kernel,
        out_shape=(
            jax.ShapeDtypeStruct((B, S, D), jnp.float32),
            jax.ShapeDtypeStruct((B, H, S, S), jnp.float32),
            jax.ShapeDtypeStruct((B, H, S, Sm), jnp.float32),
        ),
        grid_spec=pltpu.PrefetchScalarGridSpec(
            num_scalar_prefetch=0,
            grid=(B,),                                  # pipelined, megacore-shardable
            in_specs=[
                pl.BlockSpec((1, S, D), lambda b: (b, 0, 0)),    # y  (streamed)
                pl.BlockSpec((1, Sm, D), lambda b: (b, 0, 0)),   # memory (streamed)
                const_spec((D, 3 * D)), const_spec((1, 3 * D)),  # fused self QKV w/b
                const_spec((D, D)), const_spec((1, D)),          # self Wo, bo
                const_spec((D, D)), const_spec((1, D)),          # cross Wq, bq
                const_spec((D, 2 * D)), const_spec((1, 2 * D)),  # fused cross KV w/b
                const_spec((D, D)), const_spec((1, D)),          # cross Wo, bo
                const_spec((1, D)), const_spec((1, D)),          # norm1 gamma, beta
                const_spec((1, D)), const_spec((1, D)),          # norm2 gamma, beta
                const_spec((1, D)), const_spec((1, D)),          # norm3 gamma, beta
                const_spec((D, d_fc)), const_spec((d_fc, D)),    # FFN weights
            ],
            out_specs=(
                pl.BlockSpec((1, S, D), lambda b: (b, 0, 0)),        # out (streamed)
                pl.BlockSpec((1, H, S, S), lambda b: (b, 0, 0, 0)),  # self scores
                pl.BlockSpec((1, H, S, Sm), lambda b: (b, 0, 0, 0)),  # cross scores
            ),
            scratch_shapes=[pltpu.VMEM((S, D), jnp.float32)],        # per-head ctx slab
        ),
        compiler_params=pltpu.CompilerParams(
            dimension_semantics=("parallel",)),
    )(y, memory,
      w_qkv_s, b_qkv_s, params["wo_s"], params["bo_s"],
      params["wq_c"], params["bq_c"], w_kv_c, b_kv_c,
      params["wo_c"], params["bo_c"],
      params["g1"], params["be1"], params["g2"], params["be2"],
      params["g3"], params["be3"],
      params["w1"], params["w2"])
    return out, self_score, cross_score


def decoder_layer_reference(y, memory, p, n_heads):
    """Pure-JAX reference mirroring the PyTorch DecoderLayer forward semantics."""
    H = n_heads

    def ln(h, g, b):
        mu = jnp.mean(h, axis=-1, keepdims=True)
        var = jnp.mean((h - mu) ** 2, axis=-1, keepdims=True)
        return (h - mu) * jax.lax.rsqrt(var + 1e-5) * g + b

    def mha(q_in, kv_in, wq, bq, wk, bk, wv, bv, wo, bo):
        B, Sq, D = q_in.shape
        Skv = kv_in.shape[1]
        dh = D // H
        q = q_in @ wq + bq
        k = kv_in @ wk + bk
        v = kv_in @ wv + bv
        qh = q.reshape(B, Sq, H, dh).transpose(0, 2, 1, 3)
        kh = k.reshape(B, Skv, H, dh).transpose(0, 2, 1, 3)
        vh = v.reshape(B, Skv, H, dh).transpose(0, 2, 1, 3)
        s = jnp.einsum("bhqd,bhkd->bhqk", qh, kh) / jnp.sqrt(jnp.float32(dh))
        score = jax.nn.softmax(s, axis=-1)
        ctx = jnp.einsum("bhqk,bhkd->bhqd", score, vh)
        ctx = ctx.transpose(0, 2, 1, 3).reshape(B, Sq, D)
        return ctx @ wo + bo, score

    a1, self_score = mha(y, y, p["wq_s"], p["bq_s"], p["wk_s"], p["bk_s"],
                         p["wv_s"], p["bv_s"], p["wo_s"], p["bo_s"])
    n1 = ln(y + a1, p["g1"], p["be1"])
    a2, cross_score = mha(n1, memory, p["wq_c"], p["bq_c"], p["wk_c"], p["bk_c"],
                          p["wv_c"], p["bv_c"], p["wo_c"], p["bo_c"])
    n2 = ln(n1 + a2, p["g2"], p["be2"])
    ff = jnp.maximum(n2 @ p["w1"], 0.0) @ p["w2"]
    n3 = ln(n2 + ff, p["g3"], p["be3"])
    return n3, self_score, cross_score


def make_params(key, d_model, d_fc):
    D = d_model
    ks = jax.random.split(key, 18)

    def xavier_uniform(k, shape):
        fan_in, fan_out = shape
        limit = (6.0 / (fan_in + fan_out)) ** 0.5
        return jax.random.uniform(k, shape, jnp.float32, -limit, limit)

    def xavier_normal_bias(k, d):
        std = (2.0 / (1 + d)) ** 0.5
        return std * jax.random.normal(k, (1, d), jnp.float32)

    p = {}
    i = 0
    for name in ("q_s", "k_s", "v_s", "o_s", "q_c", "k_c", "v_c", "o_c"):
        p["w" + name] = xavier_uniform(ks[i], (D, D)); i += 1
        p["b" + name] = xavier_normal_bias(ks[i], D); i += 1
    # nn.Linear(d_model, d_fc, bias=False) computes x @ W.T; store pre-transposed.
    p["w1"] = xavier_uniform(ks[16], (D, d_fc))
    p["w2"] = xavier_uniform(ks[17], (d_fc, D))
    # nn.LayerNorm defaults: weight = 1, bias = 0, eps = 1e-5.
    for j in ("1", "2", "3"):
        p["g" + j] = jnp.ones((1, D), jnp.float32)
        p["be" + j] = jnp.zeros((1, D), jnp.float32)
    return p


if __name__ == "__main__":
    B, S, Sm, D, H, D_FC = 2, 8, 8, 32, 4, 64
    key = jax.random.PRNGKey(0)
    k_params, k_y, k_m = jax.random.split(key, 3)
    params = make_params(k_params, D, D_FC)
    y = jax.random.normal(k_y, (B, S, D), jnp.float32)
    memory = jax.random.normal(k_m, (B, Sm, D), jnp.float32)

    out, self_score, cross_score = decoder_layer(y, memory, params, H)
    jax.block_until_ready((out, self_score, cross_score))

    r_out, r_self, r_cross = decoder_layer_reference(y, memory, params, H)
    assert out.shape == (B, S, D)
    assert self_score.shape == (B, H, S, S)
    assert cross_score.shape == (B, H, S, Sm)
    assert jnp.allclose(out, r_out, atol=2e-3, rtol=2e-3)
    assert jnp.allclose(self_score, r_self, atol=2e-3, rtol=2e-3)
    assert jnp.allclose(cross_score, r_cross, atol=2e-3, rtol=2e-3)
    print("KERNEL_OK")
</pallas_src>

<mosaic_0001>
module attributes {stable_mosaic.version = 11 : i64} {
  func.func @decoder_layer_kernel(%arg0: i32, %arg1: memref<1x8x32xf32, #tpu.memory_space<vmem>>, %arg2: memref<1x8x32xf32, #tpu.memory_space<vmem>>, %arg3: memref<32x96xf32, #tpu.memory_space<vmem>>, %arg4: memref<1x96xf32, #tpu.memory_space<vmem>>, %arg5: memref<32x32xf32, #tpu.memory_space<vmem>>, %arg6: memref<1x32xf32, #tpu.memory_space<vmem>>, %arg7: memref<32x32xf32, #tpu.memory_space<vmem>>, %arg8: memref<1x32xf32, #tpu.memory_space<vmem>>, %arg9: memref<32x64xf32, #tpu.memory_space<vmem>>, %arg10: memref<1x64xf32, #tpu.memory_space<vmem>>, %arg11: memref<32x32xf32, #tpu.memory_space<vmem>>, %arg12: memref<1x32xf32, #tpu.memory_space<vmem>>, %arg13: memref<1x32xf32, #tpu.memory_space<vmem>>, %arg14: memref<1x32xf32, #tpu.memory_space<vmem>>, %arg15: memref<1x32xf32, #tpu.memory_space<vmem>>, %arg16: memref<1x32xf32, #tpu.memory_space<vmem>>, %arg17: memref<1x32xf32, #tpu.memory_space<vmem>>, %arg18: memref<1x32xf32, #tpu.memory_space<vmem>>, %arg19: memref<32x64xf32, #tpu.memory_space<vmem>>, %arg20: memref<64x32xf32, #tpu.memory_space<vmem>>, %arg21: memref<1x8x32xf32, #tpu.memory_space<vmem>>, %arg22: memref<1x4x8x8xf32, #tpu.memory_space<vmem>>, %arg23: memref<1x4x8x8xf32, #tpu.memory_space<vmem>>, %arg24: memref<8x32xf32, #tpu.memory_space<vmem>>) attributes {dimension_semantics = [#tpu.dimension_semantics<parallel>], iteration_bounds = array<i64: 2>, scalar_prefetch = 0 : i64, scratch_operands = 1 : i64, tpu.core_type = #tpu.core_type<tc>, window_params = [{transform_indices = @transform_0, window_bounds = array<i64: 1, 8, 32>}, {transform_indices = @transform_1, window_bounds = array<i64: 1, 8, 32>}, {pipeline_mode = #tpu.pipeline_mode<synchronous>, transform_indices = @transform_2, window_bounds = array<i64: 32, 96>}, {pipeline_mode = #tpu.pipeline_mode<synchronous>, transform_indices = @transform_3, window_bounds = array<i64: 1, 96>}, {pipeline_mode = #tpu.pipeline_mode<synchronous>, transform_indices = @transform_4, window_bounds = array<i64: 32, 32>}, {pipeline_mode = #tpu.pipeline_mode<synchronous>, transform_indices = @transform_5, window_bounds = array<i64: 1, 32>}, {pipeline_mode = #tpu.pipeline_mode<synchronous>, transform_indices = @transform_6, window_bounds = array<i64: 32, 32>}, {pipeline_mode = #tpu.pipeline_mode<synchronous>, transform_indices = @transform_7, window_bounds = array<i64: 1, 32>}, {pipeline_mode = #tpu.pipeline_mode<synchronous>, transform_indices = @transform_8, window_bounds = array<i64: 32, 64>}, {pipeline_mode = #tpu.pipeline_mode<synchronous>, transform_indices = @transform_9, window_bounds = array<i64: 1, 64>}, {pipeline_mode = #tpu.pipeline_mode<synchronous>, transform_indices = @transform_10, window_bounds = array<i64: 32, 32>}, {pipeline_mode = #tpu.pipeline_mode<synchronous>, transform_indices = @transform_11, window_bounds = array<i64: 1, 32>}, {pipeline_mode = #tpu.pipeline_mode<synchronous>, transform_indices = @transform_12, window_bounds = array<i64: 1, 32>}, {pipeline_mode = #tpu.pipeline_mode<synchronous>, transform_indices = @transform_13, window_bounds = array<i64: 1, 32>}, {pipeline_mode = #tpu.pipeline_mode<synchronous>, transform_indices = @transform_14, window_bounds = array<i64: 1, 32>}, {pipeline_mode = #tpu.pipeline_mode<synchronous>, transform_indices = @transform_15, window_bounds = array<i64: 1, 32>}, {pipeline_mode = #tpu.pipeline_mode<synchronous>, transform_indices = @transform_16, window_bounds = array<i64: 1, 32>}, {pipeline_mode = #tpu.pipeline_mode<synchronous>, transform_indices = @transform_17, window_bounds = array<i64: 1, 32>}, {pipeline_mode = #tpu.pipeline_mode<synchronous>, transform_indices = @transform_18, window_bounds = array<i64: 32, 64>}, {pipeline_mode = #tpu.pipeline_mode<synchronous>, transform_indices = @transform_19, window_bounds = array<i64: 64, 32>}, {transform_indices = @transform_20, window_bounds = array<i64: 1, 8, 32>}, {transform_indices = @transform_21, window_bounds = array<i64: 1, 4, 8, 8>}, {transform_indices = @transform_22, window_bounds = array<i64: 1, 4, 8, 8>}]} {
    %c0 = arith.constant 0 : index
    %c0_0 = arith.constant 0 : index
    %c0_1 = arith.constant 0 : index
    %0 = vector.load %arg1[%c0, %c0_0, %c0_1] : memref<1x8x32xf32, #tpu.memory_space<vmem>>, vector<1x8x32xf32>
    %1 = vector.shape_cast %0 : vector<1x8x32xf32> to vector<8x32xf32>
    %c0_2 = arith.constant 0 : index
    %c0_3 = arith.constant 0 : index
    %c0_4 = arith.constant 0 : index
    %2 = vector.load %arg2[%c0_2, %c0_3, %c0_4] : memref<1x8x32xf32, #tpu.memory_space<vmem>>, vector<1x8x32xf32>
    %3 = vector.shape_cast %2 : vector<1x8x32xf32> to vector<8x32xf32>
    %c0_5 = arith.constant 0 : index
    %c0_6 = arith.constant 0 : index
    %4 = vector.load %arg3[%c0_5, %c0_6] : memref<32x96xf32, #tpu.memory_space<vmem>>, vector<32x96xf32>
    %cst = arith.constant dense<0.000000e+00> : vector<8x96xf32>
    %5 = tpu.matmul %1, %4, %cst {dimension_numbers = #tpu.dot_dimension_numbers<[1], [0], [0], [1], [0, 0, 1, 1], [], []>} : vector<8x32xf32>, vector<32x96xf32>, vector<8x96xf32> -> vector<8x96xf32>
    %c0_7 = arith.constant 0 : index
    %c0_8 = arith.constant 0 : index
    %6 = vector.load %arg4[%c0_7, %c0_8] : memref<1x96xf32, #tpu.memory_space<vmem>>, vector<1x96xf32>
    %7 = vector.broadcast %6 : vector<1x96xf32> to vector<8x96xf32>
    %8 = arith.addf %5, %7 : vector<8x96xf32>
    %9 = vector.extract_strided_slice %8 {offsets = [0, 0], sizes = [8, 32], strides = [1, 1]} : vector<8x96xf32> to vector<8x32xf32>
    %10 = vector.extract_strided_slice %8 {offsets = [0, 32], sizes = [8, 32], strides = [1, 1]} : vector<8x96xf32> to vector<8x32xf32>
    %11 = vector.extract_strided_slice %8 {offsets = [0, 64], sizes = [8, 32], strides = [1, 1]} : vector<8x96xf32> to vector<8x32xf32>
    %cst_9 = arith.constant 0.353553385 : f32
    %12 = vector.broadcast %cst_9 : f32 to vector<8x32xf32>
    %13 = arith.mulf %9, %12 : vector<8x32xf32>
    %14 = vector.extract_strided_slice %13 {offsets = [0, 0], sizes = [8, 8], strides = [1, 1]} : vector<8x32xf32> to vector<8x8xf32>
    %15 = vector.extract_strided_slice %10 {offsets = [0, 0], sizes = [8, 8], strides = [1, 1]} : vector<8x32xf32> to vector<8x8xf32>
    %cst_10 = arith.constant dense<0.000000e+00> : vector<8x8xf32>
    %16 = tpu.matmul %14, %15, %cst_10 {dimension_numbers = #tpu.dot_dimension_numbers<[1], [1], [0], [0], [0, 0, 1, 0], [], []>} : vector<8x8xf32>, vector<8x8xf32>, vector<8x8xf32> -> vector<8x8xf32>
    %cst_11 = arith.constant dense<0xFF800000> : vector<8xf32>
    %17 = vector.multi_reduction <maximumf>, %16, %cst_11 [1] : vector<8x8xf32> to vector<8xf32>
    %18 = vector.shape_cast %17 : vector<8xf32> to vector<8x1xf32>
    %19 = vector.broadcast %18 : vector<8x1xf32> to vector<8x8xf32>
    %20 = arith.subf %16, %19 : vector<8x8xf32>
    %21 = math.exp %20 : vector<8x8xf32>
    %cst_12 = arith.constant dense<0.000000e+00> : vector<8xf32>
    %22 = vector.multi_reduction <add>, %21, %cst_12 [1] : vector<8x8xf32> to vector<8xf32>
    %23 = vector.shape_cast %22 : vector<8xf32> to vector<8x1xf32>
    %24 = vector.broadcast %23 : vector<8x1xf32> to vector<8x8xf32>
    %25 = arith.divf %21, %24 : vector<8x8xf32>
    %c0_13 = arith.constant 0 : index
    %c0_14 = arith.constant 0 : index
    %c0_15 = arith.constant 0 : index
    %c0_16 = arith.constant 0 : index
    %26 = vector.load %arg22[%c0_13, %c0_14, %c0_15, %c0_16] : memref<1x4x8x8xf32, #tpu.memory_space<vmem>>, vector<1x1x8x8xf32>
    %27 = vector.shape_cast %26 : vector<1x1x8x8xf32> to vector<8x8xf32>
    %28 = vector.shape_cast %25 : vector<8x8xf32> to vector<1x1x8x8xf32>
    tpu.vector_store %arg22[%c0_13, %c0_14, %c0_15, %c0_16], %28 {strides = array<i32>} : memref<1x4x8x8xf32, #tpu.memory_space<vmem>>, vector<1x1x8x8xf32>,
    %29 = vector.extract_strided_slice %11 {offsets = [0, 0], sizes = [8, 8], strides = [1, 1]} : vector<8x32xf32> to vector<8x8xf32>
    %cst_17 = arith.constant dense<0.000000e+00> : vector<8x8xf32>
    %30 = tpu.matmul %25, %29, %cst_17 {dimension_numbers = #tpu.dot_dimension_numbers<[1], [0], [0], [1], [0, 0, 1, 1], [], []>} : vector<8x8xf32>, vector<8x8xf32>, vector<8x8xf32> -> vector<8x8xf32>
    %c0_18 = arith.constant 0 : index
    %c0_19 = arith.constant 0 : index
    %31 = vector.load %arg24[%c0_18, %c0_19] : memref<8x32xf32, #tpu.memory_space<vmem>>, vector<8x8xf32>
    tpu.vector_store %arg24[%c0_18, %c0_19], %30 {strides = array<i32>} : memref<8x32xf32, #tpu.memory_space<vmem>>, vector<8x8xf32>,
    %32 = vector.extract_strided_slice %13 {offsets = [0, 8], sizes = [8, 8], strides = [1, 1]} : vector<8x32xf32> to vector<8x8xf32>
    %33 = vector.extract_strided_slice %10 {offsets = [0, 8], sizes = [8, 8], strides = [1, 1]} : vector<8x32xf32> to vector<8x8xf32>
    %cst_20 = arith.constant dense<0.000000e+00> : vector<8x8xf32>
    %34 = tpu.matmul %32, %33, %cst_20 {dimension_numbers = #tpu.dot_dimension_numbers<[1], [1], [0], [0], [0, 0, 1, 0], [], []>} : vector<8x8xf32>, vector<8x8xf32>, vector<8x8xf32> -> vector<8x8xf32>
    %cst_21 = arith.constant dense<0xFF800000> : vector<8xf32>
    %35 = vector.multi_reduction <maximumf>, %34, %cst_21 [1] : vector<8x8xf32> to vector<8xf32>
    %36 = vector.shape_cast %35 : vector<8xf32> to vector<8x1xf32>
    %37 = vector.broadcast %36 : vector<8x1xf32> to vector<8x8xf32>
    %38 = arith.subf %34, %37 : vector<8x8xf32>
    %39 = math.exp %38 : vector<8x8xf32>
    %cst_22 = arith.constant dense<0.000000e+00> : vector<8xf32>
    %40 = vector.multi_reduction <add>, %39, %cst_22 [1] : vector<8x8xf32> to vector<8xf32>
    %41 = vector.shape_cast %40 : vector<8xf32> to vector<8x1xf32>
    %42 = vector.broadcast %41 : vector<8x1xf32> to vector<8x8xf32>
    %43 = arith.divf %39, %42 : vector<8x8xf32>
    %c0_23 = arith.constant 0 : index
    %c1 = arith.constant 1 : index
    %c0_24 = arith.constant 0 : index
    %c0_25 = arith.constant 0 : index
    %44 = vector.load %arg22[%c0_23, %c1, %c0_24, %c0_25] : memref<1x4x8x8xf32, #tpu.memory_space<vmem>>, vector<1x1x8x8xf32>
    %45 = vector.shape_cast %44 : vector<1x1x8x8xf32> to vector<8x8xf32>
    %46 = vector.shape_cast %43 : vector<8x8xf32> to vector<1x1x8x8xf32>
    tpu.vector_store %arg22[%c0_23, %c1, %c0_24, %c0_25], %46 {strides = array<i32>} : memref<1x4x8x8xf32, #tpu.memory_space<vmem>>, vector<1x1x8x8xf32>,
    %47 = vector.extract_strided_slice %11 {offsets = [0, 8], sizes = [8, 8], strides = [1, 1]} : vector<8x32xf32> to vector<8x8xf32>
    %cst_26 = arith.constant dense<0.000000e+00> : vector<8x8xf32>
    %48 = tpu.matmul %43, %47, %cst_26 {dimension_numbers = #tpu.dot_dimension_numbers<[1], [0], [0], [1], [0, 0, 1, 1], [], []>} : vector<8x8xf32>, vector<8x8xf32>, vector<8x8xf32> -> vector<8x8xf32>
    %c0_27 = arith.constant 0 : index
    %c8 = arith.constant 8 : index
    %49 = vector.load %arg24[%c0_27, %c8] : memref<8x32xf32, #tpu.memory_space<vmem>>, vector<8x8xf32>
    tpu.vector_store %arg24[%c0_27, %c8], %48 {strides = array<i32>} : memref<8x32xf32, #tpu.memory_space<vmem>>, vector<8x8xf32>,
    %50 = vector.extract_strided_slice %13 {offsets = [0, 16], sizes = [8, 8], strides = [1, 1]} : vector<8x32xf32> to vector<8x8xf32>
    %51 = vector.extract_strided_slice %10 {offsets = [0, 16], sizes = [8, 8], strides = [1, 1]} : vector<8x32xf32> to vector<8x8xf32>
    %cst_28 = arith.constant dense<0.000000e+00> : vector<8x8xf32>
    %52 = tpu.matmul %50, %51, %cst_28 {dimension_numbers = #tpu.dot_dimension_numbers<[1], [1], [0], [0], [0, 0, 1, 0], [], []>} : vector<8x8xf32>, vector<8x8xf32>, vector<8x8xf32> -> vector<8x8xf32>
    %cst_29 = arith.constant dense<0xFF800000> : vector<8xf32>
    %53 = vector.multi_reduction <maximumf>, %52, %cst_29 [1] : vector<8x8xf32> to vector<8xf32>
    %54 = vector.shape_cast %53 : vector<8xf32> to vector<8x1xf32>
    %55 = vector.broadcast %54 : vector<8x1xf32> to vector<8x8xf32>
    %56 = arith.subf %52, %55 : vector<8x8xf32>
    %57 = math.exp %56 : vector<8x8xf32>
    %cst_30 = arith.constant dense<0.000000e+00> : vector<8xf32>
    %58 = vector.multi_reduction <add>, %57, %cst_30 [1] : vector<8x8xf32> to vector<8xf32>
    %59 = vector.shape_cast %58 : vector<8xf32> to vector<8x1xf32>
    %60 = vector.broadcast %59 : vector<8x1xf32> to vector<8x8xf32>
    %61 = arith.divf %57, %60 : vector<8x8xf32>
    %c0_31 = arith.constant 0 : index
    %c2 = arith.constant 2 : index
    %c0_32 = arith.constant 0 : index
    %c0_33 = arith.constant 0 : index
    %62 = vector.load %arg22[%c0_31, %c2, %c0_32, %c0_33] : memref<1x4x8x8xf32, #tpu.memory_space<vmem>>, vector<1x1x8x8xf32>
    %63 = vector.shape_cast %62 : vector<1x1x8x8xf32> to vector<8x8xf32>
    %64 = vector.shape_cast %61 : vector<8x8xf32> to vector<1x1x8x8xf32>
    tpu.vector_store %arg22[%c0_31, %c2, %c0_32, %c0_33], %64 {strides = array<i32>} : memref<1x4x8x8xf32, #tpu.memory_space<vmem>>, vector<1x1x8x8xf32>,
    %65 = vector.extract_strided_slice %11 {offsets = [0, 16], sizes = [8, 8], strides = [1, 1]} : vector<8x32xf32> to vector<8x8xf32>
    %cst_34 = arith.constant dense<0.000000e+00> : vector<8x8xf32>
    %66 = tpu.matmul %61, %65, %cst_34 {dimension_numbers = #tpu.dot_dimension_numbers<[1], [0], [0], [1], [0, 0, 1, 1], [], []>} : vector<8x8xf32>, vector<8x8xf32>, vector<8x8xf32> -> vector<8x8xf32>
    %c0_35 = arith.constant 0 : index
    %c16 = arith.constant 16 : index
    %67 = vector.load %arg24[%c0_35, %c16] : memref<8x32xf32, #tpu.memory_space<vmem>>, vector<8x8xf32>
    tpu.vector_store %arg24[%c0_35, %c16], %66 {strides = array<i32>} : memref<8x32xf32, #tpu.memory_space<vmem>>, vector<8x8xf32>,
    %68 = vector.extract_strided_slice %13 {offsets = [0, 24], sizes = [8, 8], strides = [1, 1]} : vector<8x32xf32> to vector<8x8xf32>
    %69 = vector.extract_strided_slice %10 {offsets = [0, 24], sizes = [8, 8], strides = [1, 1]} : vector<8x32xf32> to vector<8x8xf32>
    %cst_36 = arith.constant dense<0.000000e+00> : vector<8x8xf32>
    %70 = tpu.matmul %68, %69, %cst_36 {dimension_numbers = #tpu.dot_dimension_numbers<[1], [1], [0], [0], [0, 0, 1, 0], [], []>} : vector<8x8xf32>, vector<8x8xf32>, vector<8x8xf32> -> vector<8x8xf32>
    %cst_37 = arith.constant dense<0xFF800000> : vector<8xf32>
    %71 = vector.multi_reduction <maximumf>, %70, %cst_37 [1] : vector<8x8xf32> to vector<8xf32>
    %72 = vector.shape_cast %71 : vector<8xf32> to vector<8x1xf32>
    %73 = vector.broadcast %72 : vector<8x1xf32> to vector<8x8xf32>
    %74 = arith.subf %70, %73 : vector<8x8xf32>
    %75 = math.exp %74 : vector<8x8xf32>
    %cst_38 = arith.constant dense<0.000000e+00> : vector<8xf32>
    %76 = vector.multi_reduction <add>, %75, %cst_38 [1] : vector<8x8xf32> to vector<8xf32>
    %77 = vector.shape_cast %76 : vector<8xf32> to vector<8x1xf32>
    %78 = vector.broadcast %77 : vector<8x1xf32> to vector<8x8xf32>
    %79 = arith.divf %75, %78 : vector<8x8xf32>
    %c0_39 = arith.constant 0 : index
    %c3 = arith.constant 3 : index
    %c0_40 = arith.constant 0 : index
    %c0_41 = arith.constant 0 : index
    %80 = vector.load %arg22[%c0_39, %c3, %c0_40, %c0_41] : memref<1x4x8x8xf32, #tpu.memory_space<vmem>>, vector<1x1x8x8xf32>
    %81 = vector.shape_cast %80 : vector<1x1x8x8xf32> to vector<8x8xf32>
    %82 = vector.shape_cast %79 : vector<8x8xf32> to vector<1x1x8x8xf32>
    tpu.vector_store %arg22[%c0_39, %c3, %c0_40, %c0_41], %82 {strides = array<i32>} : memref<1x4x8x8xf32, #tpu.memory_space<vmem>>, vector<1x1x8x8xf32>,
    %83 = vector.extract_strided_slice %11 {offsets = [0, 24], sizes = [8, 8], strides = [1, 1]} : vector<8x32xf32> to vector<8x8xf32>
    %cst_42 = arith.constant dense<0.000000e+00> : vector<8x8xf32>
    %84 = tpu.matmul %79, %83, %cst_42 {dimension_numbers = #tpu.dot_dimension_numbers<[1], [0], [0], [1], [0, 0, 1, 1], [], []>} : vector<8x8xf32>, vector<8x8xf32>, vector<8x8xf32> -> vector<8x8xf32>
    %c0_43 = arith.constant 0 : index
    %c24 = arith.constant 24 : index
    %85 = vector.load %arg24[%c0_43, %c24] : memref<8x32xf32, #tpu.memory_space<vmem>>, vector<8x8xf32>
    tpu.vector_store %arg24[%c0_43, %c24], %84 {strides = array<i32>} : memref<8x32xf32, #tpu.memory_space<vmem>>, vector<8x8xf32>,
    %c0_44 = arith.constant 0 : index
    %c0_45 = arith.constant 0 : index
    %86 = vector.load %arg24[%c0_44, %c0_45] : memref<8x32xf32, #tpu.memory_space<vmem>>, vector<8x32xf32>
    %c0_46 = arith.constant 0 : index
    %c0_47 = arith.constant 0 : index
    %87 = vector.load %arg5[%c0_46, %c0_47] : memref<32x32xf32, #tpu.memory_space<vmem>>, vector<32x32xf32>
    %cst_48 = arith.constant dense<0.000000e+00> : vector<8x32xf32>
    %88 = tpu.matmul %86, %87, %cst_48 {dimension_numbers = #tpu.dot_dimension_numbers<[1], [0], [0], [1], [0, 0, 1, 1], [], []>} : vector<8x32xf32>, vector<32x32xf32>, vector<8x32xf32> -> vector<8x32xf32>
    %c0_49 = arith.constant 0 : index
    %c0_50 = arith.constant 0 : index
    %89 = vector.load %arg6[%c0_49, %c0_50] : memref<1x32xf32, #tpu.memory_space<vmem>>, vector<1x32xf32>
    %90 = vector.broadcast %89 : vector<1x32xf32> to vector<8x32xf32>
    %91 = arith.addf %88, %90 : vector<8x32xf32>
    %92 = arith.addf %1, %91 : vector<8x32xf32>
    %cst_51 = arith.constant dense<0.000000e+00> : vector<8xf32>
    %93 = vector.multi_reduction <add>, %92, %cst_51 [1] : vector<8x32xf32> to vector<8xf32>
    %94 = vector.shape_cast %93 : vector<8xf32> to vector<8x1xf32>
    %cst_52 = arith.constant 3.200000e+01 : f32
    %95 = vector.broadcast %cst_52 : f32 to vector<8x1xf32>
    %96 = arith.divf %94, %95 : vector<8x1xf32>
    %97 = vector.broadcast %96 : vector<8x1xf32> to vector<8x32xf32>
    %98 = arith.subf %92, %97 : vector<8x32xf32>
    %99 = arith.mulf %98, %98 : vector<8x32xf32>
    %cst_53 = arith.constant dense<0.000000e+00> : vector<8xf32>
    %100 = vector.multi_reduction <add>, %99, %cst_53 [1] : vector<8x32xf32> to vector<8xf32>
    %101 = vector.shape_cast %100 : vector<8xf32> to vector<8x1xf32>
    %cst_54 = arith.constant 3.200000e+01 : f32
    %102 = vector.broadcast %cst_54 : f32 to vector<8x1xf32>
    %103 = arith.divf %101, %102 : vector<8x1xf32>
    %cst_55 = arith.constant 9.99999974E-6 : f32
    %104 = vector.broadcast %cst_55 : f32 to vector<8x1xf32>
    %105 = arith.addf %103, %104 : vector<8x1xf32>
    %106 = math.rsqrt %105 : vector<8x1xf32>
    %107 = vector.broadcast %106 : vector<8x1xf32> to vector<8x32xf32>
    %108 = arith.mulf %98, %107 : vector<8x32xf32>
    %c0_56 = arith.constant 0 : index
    %c0_57 = arith.constant 0 : index
    %109 = vector.load %arg13[%c0_56, %c0_57] : memref<1x32xf32, #tpu.memory_space<vmem>>, vector<1x32xf32>
    %110 = vector.broadcast %109 : vector<1x32xf32> to vector<8x32xf32>
    %111 = arith.mulf %108, %110 : vector<8x32xf32>
    %c0_58 = arith.constant 0 : index
    %c0_59 = arith.constant 0 : index
    %112 = vector.load %arg14[%c0_58, %c0_59] : memref<1x32xf32, #tpu.memory_space<vmem>>, vector<1x32xf32>
    %113 = vector.broadcast %112 : vector<1x32xf32> to vector<8x32xf32>
    %114 = arith.addf %111, %113 : vector<8x32xf32>
    %c0_60 = arith.constant 0 : index
    %c0_61 = arith.constant 0 : index
    %115 = vector.load %arg7[%c0_60, %c0_61] : memref<32x32xf32, #tpu.memory_space<vmem>>, vector<32x32xf32>
    %cst_62 = arith.constant dense<0.000000e+00> : vector<8x32xf32>
    %116 = tpu.matmul %114, %115, %cst_62 {dimension_numbers = #tpu.dot_dimension_numbers<[1], [0], [0], [1], [0, 0, 1, 1], [], []>} : vector<8x32xf32>, vector<32x32xf32>, vector<8x32xf32> -> vector<8x32xf32>
    %c0_63 = arith.constant 0 : index
    %c0_64 = arith.constant 0 : index
    %117 = vector.load %arg8[%c0_63, %c0_64] : memref<1x32xf32, #tpu.memory_space<vmem>>, vector<1x32xf32>
    %118 = vector.broadcast %117 : vector<1x32xf32> to vector<8x32xf32>
    %119 = arith.addf %116, %118 : vector<8x32xf32>
    %c0_65 = arith.constant 0 : index
    %c0_66 = arith.constant 0 : index
    %120 = vector.load %arg9[%c0_65, %c0_66] : memref<32x64xf32, #tpu.memory_space<vmem>>, vector<32x64xf32>
    %cst_67 = arith.constant dense<0.000000e+00> : vector<8x64xf32>
    %121 = tpu.matmul %3, %120, %cst_67 {dimension_numbers = #tpu.dot_dimension_numbers<[1], [0], [0], [1], [0, 0, 1, 1], [], []>} : vector<8x32xf32>, vector<32x64xf32>, vector<8x64xf32> -> vector<8x64xf32>
    %c0_68 = arith.constant 0 : index
    %c0_69 = arith.constant 0 : index
    %122 = vector.load %arg10[%c0_68, %c0_69] : memref<1x64xf32, #tpu.memory_space<vmem>>, vector<1x64xf32>
    %123 = vector.broadcast %122 : vector<1x64xf32> to vector<8x64xf32>
    %124 = arith.addf %121, %123 : vector<8x64xf32>
    %125 = vector.extract_strided_slice %124 {offsets = [0, 0], sizes = [8, 32], strides = [1, 1]} : vector<8x64xf32> to vector<8x32xf32>
    %126 = vector.extract_strided_slice %124 {offsets = [0, 32], sizes = [8, 32], strides = [1, 1]} : vector<8x64xf32> to vector<8x32xf32>
    %cst_70 = arith.constant 0.353553385 : f32
    %127 = vector.broadcast %cst_70 : f32 to vector<8x32xf32>
    %128 = arith.mulf %119, %127 : vector<8x32xf32>
    %129 = vector.extract_strided_slice %128 {offsets = [0, 0], sizes = [8, 8], strides = [1, 1]} : vector<8x32xf32> to vector<8x8xf32>
    %130 = vector.extract_strided_slice %125 {offsets = [0, 0], sizes = [8, 8], strides = [1, 1]} : vector<8x32xf32> to vector<8x8xf32>
    %cst_71 = arith.constant dense<0.000000e+00> : vector<8x8xf32>
    %131 = tpu.matmul %129, %130, %cst_71 {dimension_numbers = #tpu.dot_dimension_numbers<[1], [1], [0], [0], [0, 0, 1, 0], [], []>} : vector<8x8xf32>, vector<8x8xf32>, vector<8x8xf32> -> vector<8x8xf32>
    %cst_72 = arith.constant dense<0xFF800000> : vector<8xf32>
    %132 = vector.multi_reduction <maximumf>, %131, %cst_72 [1] : vector<8x8xf32> to vector<8xf32>
    %133 = vector.shape_cast %132 : vector<8xf32> to vector<8x1xf32>
    %134 = vector.broadcast %133 : vector<8x1xf32> to vector<8x8xf32>
    %135 = arith.subf %131, %134 : vector<8x8xf32>
    %136 = math.exp %135 : vector<8x8xf32>
    %cst_73 = arith.constant dense<0.000000e+00> : vector<8xf32>
    %137 = vector.multi_reduction <add>, %136, %cst_73 [1] : vector<8x8xf32> to vector<8xf32>
    %138 = vector.shape_cast %137 : vector<8xf32> to vector<8x1xf32>
    %139 = vector.broadcast %138 : vector<8x1xf32> to vector<8x8xf32>
    %140 = arith.divf %136, %139 : vector<8x8xf32>
    %c0_74 = arith.constant 0 : index
    %c0_75 = arith.constant 0 : index
    %c0_76 = arith.constant 0 : index
    %c0_77 = arith.constant 0 : index
    %141 = vector.load %arg23[%c0_74, %c0_75, %c0_76, %c0_77] : memref<1x4x8x8xf32, #tpu.memory_space<vmem>>, vector<1x1x8x8xf32>
    %142 = vector.shape_cast %141 : vector<1x1x8x8xf32> to vector<8x8xf32>
    %143 = vector.shape_cast %140 : vector<8x8xf32> to vector<1x1x8x8xf32>
    tpu.vector_store %arg23[%c0_74, %c0_75, %c0_76, %c0_77], %143 {strides = array<i32>} : memref<1x4x8x8xf32, #tpu.memory_space<vmem>>, vector<1x1x8x8xf32>,
    %144 = vector.extract_strided_slice %126 {offsets = [0, 0], sizes = [8, 8], strides = [1, 1]} : vector<8x32xf32> to vector<8x8xf32>
    %cst_78 = arith.constant dense<0.000000e+00> : vector<8x8xf32>
    %145 = tpu.matmul %140, %144, %cst_78 {dimension_numbers = #tpu.dot_dimension_numbers<[1], [0], [0], [1], [0, 0, 1, 1], [], []>} : vector<8x8xf32>, vector<8x8xf32>, vector<8x8xf32> -> vector<8x8xf32>
    %c0_79 = arith.constant 0 : index
    %c0_80 = arith.constant 0 : index
    %146 = vector.load %arg24[%c0_79, %c0_80] : memref<8x32xf32, #tpu.memory_space<vmem>>, vector<8x8xf32>
    tpu.vector_store %arg24[%c0_79, %c0_80], %145 {strides = array<i32>} : memref<8x32xf32, #tpu.memory_space<vmem>>, vector<8x8xf32>,
    %147 = vector.extract_strided_slice %128 {offsets = [0, 8], sizes = [8, 8], strides = [1, 1]} : vector<8x32xf32> to vector<8x8xf32>
    %148 = vector.extract_strided_slice %125 {offsets = [0, 8], sizes = [8, 8], strides = [1, 1]} : vector<8x32xf32> to vector<8x8xf32>
    %cst_81 = arith.constant dense<0.000000e+00> : vector<8x8xf32>
    %149 = tpu.matmul %147, %148, %cst_81 {dimension_numbers = #tpu.dot_dimension_numbers<[1], [1], [0], [0], [0, 0, 1, 0], [], []>} : vector<8x8xf32>, vector<8x8xf32>, vector<8x8xf32> -> vector<8x8xf32>
    %cst_82 = arith.constant dense<0xFF800000> : vector<8xf32>
    %150 = vector.multi_reduction <maximumf>, %149, %cst_82 [1] : vector<8x8xf32> to vector<8xf32>
    %151 = vector.shape_cast %150 : vector<8xf32> to vector<8x1xf32>
    %152 = vector.broadcast %151 : vector<8x1xf32> to vector<8x8xf32>
    %153 = arith.subf %149, %152 : vector<8x8xf32>
    %154 = math.exp %153 : vector<8x8xf32>
    %cst_83 = arith.constant dense<0.000000e+00> : vector<8xf32>
    %155 = vector.multi_reduction <add>, %154, %cst_83 [1] : vector<8x8xf32> to vector<8xf32>
    %156 = vector.shape_cast %155 : vector<8xf32> to vector<8x1xf32>
    %157 = vector.broadcast %156 : vector<8x1xf32> to vector<8x8xf32>
    %158 = arith.divf %154, %157 : vector<8x8xf32>
    %c0_84 = arith.constant 0 : index
    %c1_85 = arith.constant 1 : index
    %c0_86 = arith.constant 0 : index
    %c0_87 = arith.constant 0 : index
    %159 = vector.load %arg23[%c0_84, %c1_85, %c0_86, %c0_87] : memref<1x4x8x8xf32, #tpu.memory_space<vmem>>, vector<1x1x8x8xf32>
    %160 = vector.shape_cast %159 : vector<1x1x8x8xf32> to vector<8x8xf32>
    %161 = vector.shape_cast %158 : vector<8x8xf32> to vector<1x1x8x8xf32>
    tpu.vector_store %arg23[%c0_84, %c1_85, %c0_86, %c0_87], %161 {strides = array<i32>} : memref<1x4x8x8xf32, #tpu.memory_space<vmem>>, vector<1x1x8x8xf32>,
    %162 = vector.extract_strided_slice %126 {offsets = [0, 8], sizes = [8, 8], strides = [1, 1]} : vector<8x32xf32> to vector<8x8xf32>
    %cst_88 = arith.constant dense<0.000000e+00> : vector<8x8xf32>
    %163 = tpu.matmul %158, %162, %cst_88 {dimension_numbers = #tpu.dot_dimension_numbers<[1], [0], [0], [1], [0, 0, 1, 1], [], []>} : vector<8x8xf32>, vector<8x8xf32>, vector<8x8xf32> -> vector<8x8xf32>
    %c0_89 = arith.constant 0 : index
    %c8_90 = arith.constant 8 : index
    %164 = vector.load %arg24[%c0_89, %c8_90] : memref<8x32xf32, #tpu.memory_space<vmem>>, vector<8x8xf32>
    tpu.vector_store %arg24[%c0_89, %c8_90], %163 {strides = array<i32>} : memref<8x32xf32, #tpu.memory_space<vmem>>, vector<8x8xf32>,
    %165 = vector.extract_strided_slice %128 {offsets = [0, 16], sizes = [8, 8], strides = [1, 1]} : vector<8x32xf32> to vector<8x8xf32>
    %166 = vector.extract_strided_slice %125 {offsets = [0, 16], sizes = [8, 8], strides = [1, 1]} : vector<8x32xf32> to vector<8x8xf32>
    %cst_91 = arith.constant dense<0.000000e+00> : vector<8x8xf32>
    %167 = tpu.matmul %165, %166, %cst_91 {dimension_numbers = #tpu.dot_dimension_numbers<[1], [1], [0], [0], [0, 0, 1, 0], [], []>} : vector<8x8xf32>, vector<8x8xf32>, vector<8x8xf32> -> vector<8x8xf32>
    %cst_92 = arith.constant dense<0xFF800000> : vector<8xf32>
    %168 = vector.multi_reduction <maximumf>, %167, %cst_92 [1] : vector<8x8xf32> to vector<8xf32>
    %169 = vector.shape_cast %168 : vector<8xf32> to vector<8x1xf32>
    %170 = vector.broadcast %169 : vector<8x1xf32> to vector<8x8xf32>
    %171 = arith.subf %167, %170 : vector<8x8xf32>
    %172 = math.exp %171 : vector<8x8xf32>
    %cst_93 = arith.constant dense<0.000000e+00> : vector<8xf32>
    %173 = vector.multi_reduction <add>, %172, %cst_93 [1] : vector<8x8xf32> to vector<8xf32>
    %174 = vector.shape_cast %173 : vector<8xf32> to vector<8x1xf32>
    %175 = vector.broadcast %174 : vector<8x1xf32> to vector<8x8xf32>
    %176 = arith.divf %172, %175 : vector<8x8xf32>
    %c0_94 = arith.constant 0 : index
    %c2_95 = arith.constant 2 : index
    %c0_96 = arith.constant 0 : index
    %c0_97 = arith.constant 0 : index
    %177 = vector.load %arg23[%c0_94, %c2_95, %c0_96, %c0_97] : memref<1x4x8x8xf32, #tpu.memory_space<vmem>>, vector<1x1x8x8xf32>
    %178 = vector.shape_cast %177 : vector<1x1x8x8xf32> to vector<8x8xf32>
    %179 = vector.shape_cast %176 : vector<8x8xf32> to vector<1x1x8x8xf32>
    tpu.vector_store %arg23[%c0_94, %c2_95, %c0_96, %c0_97], %179 {strides = array<i32>} : memref<1x4x8x8xf32, #tpu.memory_space<vmem>>, vector<1x1x8x8xf32>,
    %180 = vector.extract_strided_slice %126 {offsets = [0, 16], sizes = [8, 8], strides = [1, 1]} : vector<8x32xf32> to vector<8x8xf32>
    %cst_98 = arith.constant dense<0.000000e+00> : vector<8x8xf32>
    %181 = tpu.matmul %176, %180, %cst_98 {dimension_numbers = #tpu.dot_dimension_numbers<[1], [0], [0], [1], [0, 0, 1, 1], [], []>} : vector<8x8xf32>, vector<8x8xf32>, vector<8x8xf32> -> vector<8x8xf32>
    %c0_99 = arith.constant 0 : index
    %c16_100 = arith.constant 16 : index
    %182 = vector.load %arg24[%c0_99, %c16_100] : memref<8x32xf32, #tpu.memory_space<vmem>>, vector<8x8xf32>
    tpu.vector_store %arg24[%c0_99, %c16_100], %181 {strides = array<i32>} : memref<8x32xf32, #tpu.memory_space<vmem>>, vector<8x8xf32>,
    %183 = vector.extract_strided_slice %128 {offsets = [0, 24], sizes = [8, 8], strides = [1, 1]} : vector<8x32xf32> to vector<8x8xf32>
    %184 = vector.extract_strided_slice %125 {offsets = [0, 24], sizes = [8, 8], strides = [1, 1]} : vector<8x32xf32> to vector<8x8xf32>
    %cst_101 = arith.constant dense<0.000000e+00> : vector<8x8xf32>
    %185 = tpu.matmul %183, %184, %cst_101 {dimension_numbers = #tpu.dot_dimension_numbers<[1], [1], [0], [0], [0, 0, 1, 0], [], []>} : vector<8x8xf32>, vector<8x8xf32>, vector<8x8xf32> -> vector<8x8xf32>
    %cst_102 = arith.constant dense<0xFF800000> : vector<8xf32>
    %186 = vector.multi_reduction <maximumf>, %185, %cst_102 [1] : vector<8x8xf32> to vector<8xf32>
    %187 = vector.shape_cast %186 : vector<8xf32> to vector<8x1xf32>
    %188 = vector.broadcast %187 : vector<8x1xf32> to vector<8x8xf32>
    %189 = arith.subf %185, %188 : vector<8x8xf32>
    %190 = math.exp %189 : vector<8x8xf32>
    %cst_103 = arith.constant dense<0.000000e+00> : vector<8xf32>
    %191 = vector.multi_reduction <add>, %190, %cst_103 [1] : vector<8x8xf32> to vector<8xf32>
    %192 = vector.shape_cast %191 : vector<8xf32> to vector<8x1xf32>
    %193 = vector.broadcast %192 : vector<8x1xf32> to vector<8x8xf32>
    %194 = arith.divf %190, %193 : vector<8x8xf32>
    %c0_104 = arith.constant 0 : index
    %c3_105 = arith.constant 3 : index
    %c0_106 = arith.constant 0 : index
    %c0_107 = arith.constant 0 : index
    %195 = vector.load %arg23[%c0_104, %c3_105, %c0_106, %c0_107] : memref<1x4x8x8xf32, #tpu.memory_space<vmem>>, vector<1x1x8x8xf32>
    %196 = vector.shape_cast %195 : vector<1x1x8x8xf32> to vector<8x8xf32>
    %197 = vector.shape_cast %194 : vector<8x8xf32> to vector<1x1x8x8xf32>
    tpu.vector_store %arg23[%c0_104, %c3_105, %c0_106, %c0_107], %197 {strides = array<i32>} : memref<1x4x8x8xf32, #tpu.memory_space<vmem>>, vector<1x1x8x8xf32>,
    %198 = vector.extract_strided_slice %126 {offsets = [0, 24], sizes = [8, 8], strides = [1, 1]} : vector<8x32xf32> to vector<8x8xf32>
    %cst_108 = arith.constant dense<0.000000e+00> : vector<8x8xf32>
    %199 = tpu.matmul %194, %198, %cst_108 {dimension_numbers = #tpu.dot_dimension_numbers<[1], [0], [0], [1], [0, 0, 1, 1], [], []>} : vector<8x8xf32>, vector<8x8xf32>, vector<8x8xf32> -> vector<8x8xf32>
    %c0_109 = arith.constant 0 : index
    %c24_110 = arith.constant 24 : index
    %200 = vector.load %arg24[%c0_109, %c24_110] : memref<8x32xf32, #tpu.memory_space<vmem>>, vector<8x8xf32>
    tpu.vector_store %arg24[%c0_109, %c24_110], %199 {strides = array<i32>} : memref<8x32xf32, #tpu.memory_space<vmem>>, vector<8x8xf32>,
    %c0_111 = arith.constant 0 : index
    %c0_112 = arith.constant 0 : index
    %201 = vector.load %arg24[%c0_111, %c0_112] : memref<8x32xf32, #tpu.memory_space<vmem>>, vector<8x32xf32>
    %c0_113 = arith.constant 0 : index
    %c0_114 = arith.constant 0 : index
    %202 = vector.load %arg11[%c0_113, %c0_114] : memref<32x32xf32, #tpu.memory_space<vmem>>, vector<32x32xf32>
    %cst_115 = arith.constant dense<0.000000e+00> : vector<8x32xf32>
    %203 = tpu.matmul %201, %202, %cst_115 {dimension_numbers = #tpu.dot_dimension_numbers<[1], [0], [0], [1], [0, 0, 1, 1], [], []>} : vector<8x32xf32>, vector<32x32xf32>, vector<8x32xf32> -> vector<8x32xf32>
    %c0_116 = arith.constant 0 : index
    %c0_117 = arith.constant 0 : index
    %204 = vector.load %arg12[%c0_116, %c0_117] : memref<1x32xf32, #tpu.memory_space<vmem>>, vector<1x32xf32>
    %205 = vector.broadcast %204 : vector<1x32xf32> to vector<8x32xf32>
    %206 = arith.addf %203, %205 : vector<8x32xf32>
    %207 = arith.addf %114, %206 : vector<8x32xf32>
    %cst_118 = arith.constant dense<0.000000e+00> : vector<8xf32>
    %208 = vector.multi_reduction <add>, %207, %cst_118 [1] : vector<8x32xf32> to vector<8xf32>
    %209 = vector.shape_cast %208 : vector<8xf32> to vector<8x1xf32>
    %cst_119 = arith.constant 3.200000e+01 : f32
    %210 = vector.broadcast %cst_119 : f32 to vector<8x1xf32>
    %211 = arith.divf %209, %210 : vector<8x1xf32>
    %212 = vector.broadcast %211 : vector<8x1xf32> to vector<8x32xf32>
    %213 = arith.subf %207, %212 : vector<8x32xf32>
    %214 = arith.mulf %213, %213 : vector<8x32xf32>
    %cst_120 = arith.constant dense<0.000000e+00> : vector<8xf32>
    %215 = vector.multi_reduction <add>, %214, %cst_120 [1] : vector<8x32xf32> to vector<8xf32>
    %216 = vector.shape_cast %215 : vector<8xf32> to vector<8x1xf32>
    %cst_121 = arith.constant 3.200000e+01 : f32
    %217 = vector.broadcast %cst_121 : f32 to vector<8x1xf32>
    %218 = arith.divf %216, %217 : vector<8x1xf32>
    %cst_122 = arith.constant 9.99999974E-6 : f32
    %219 = vector.broadcast %cst_122 : f32 to vector<8x1xf32>
    %220 = arith.addf %218, %219 : vector<8x1xf32>
    %221 = math.rsqrt %220 : vector<8x1xf32>
    %222 = vector.broadcast %221 : vector<8x1xf32> to vector<8x32xf32>
    %223 = arith.mulf %213, %222 : vector<8x32xf32>
    %c0_123 = arith.constant 0 : index
    %c0_124 = arith.constant 0 : index
    %224 = vector.load %arg15[%c0_123, %c0_124] : memref<1x32xf32, #tpu.memory_space<vmem>>, vector<1x32xf32>
    %225 = vector.broadcast %224 : vector<1x32xf32> to vector<8x32xf32>
    %226 = arith.mulf %223, %225 : vector<8x32xf32>
    %c0_125 = arith.constant 0 : index
    %c0_126 = arith.constant 0 : index
    %227 = vector.load %arg16[%c0_125, %c0_126] : memref<1x32xf32, #tpu.memory_space<vmem>>, vector<1x32xf32>
    %228 = vector.broadcast %227 : vector<1x32xf32> to vector<8x32xf32>
    %229 = arith.addf %226, %228 : vector<8x32xf32>
    %c0_127 = arith.constant 0 : index
    %c0_128 = arith.constant 0 : index
    %230 = vector.load %arg19[%c0_127, %c0_128] : memref<32x64xf32, #tpu.memory_space<vmem>>, vector<32x64xf32>
    %cst_129 = arith.constant dense<0.000000e+00> : vector<8x64xf32>
    %231 = tpu.matmul %229, %230, %cst_129 {dimension_numbers = #tpu.dot_dimension_numbers<[1], [0], [0], [1], [0, 0, 1, 1], [], []>} : vector<8x32xf32>, vector<32x64xf32>, vector<8x64xf32> -> vector<8x64xf32>
    %cst_130 = arith.constant 0.000000e+00 : f32
    %232 = vector.broadcast %cst_130 : f32 to vector<8x64xf32>
    %233 = arith.maximumf %231, %232 : vector<8x64xf32>
    %c0_131 = arith.constant 0 : index
    %c0_132 = arith.constant 0 : index
    %234 = vector.load %arg20[%c0_131, %c0_132] : memref<64x32xf32, #tpu.memory_space<vmem>>, vector<64x32xf32>
    %cst_133 = arith.constant dense<0.000000e+00> : vector<8x32xf32>
    %235 = tpu.matmul %233, %234, %cst_133 {dimension_numbers = #tpu.dot_dimension_numbers<[1], [0], [0], [1], [0, 0, 1, 1], [], []>} : vector<8x64xf32>, vector<64x32xf32>, vector<8x32xf32> -> vector<8x32xf32>
    %236 = arith.addf %229, %235 : vector<8x32xf32>
    %cst_134 = arith.constant dense<0.000000e+00> : vector<8xf32>
    %237 = vector.multi_reduction <add>, %236, %cst_134 [1] : vector<8x32xf32> to vector<8xf32>
    %238 = vector.shape_cast %237 : vector<8xf32> to vector<8x1xf32>
    %cst_135 = arith.constant 3.200000e+01 : f32
    %239 = vector.broadcast %cst_135 : f32 to vector<8x1xf32>
    %240 = arith.divf %238, %239 : vector<8x1xf32>
    %241 = vector.broadcast %240 : vector<8x1xf32> to vector<8x32xf32>
    %242 = arith.subf %236, %241 : vector<8x32xf32>
    %243 = arith.mulf %242, %242 : vector<8x32xf32>
    %cst_136 = arith.constant dense<0.000000e+00> : vector<8xf32>
    %244 = vector.multi_reduction <add>, %243, %cst_136 [1] : vector<8x32xf32> to vector<8xf32>
    %245 = vector.shape_cast %244 : vector<8xf32> to vector<8x1xf32>
    %cst_137 = arith.constant 3.200000e+01 : f32
    %246 = vector.broadcast %cst_137 : f32 to vector<8x1xf32>
    %247 = arith.divf %245, %246 : vector<8x1xf32>
    %cst_138 = arith.constant 9.99999974E-6 : f32
    %248 = vector.broadcast %cst_138 : f32 to vector<8x1xf32>
    %249 = arith.addf %247, %248 : vector<8x1xf32>
    %250 = math.rsqrt %249 : vector<8x1xf32>
    %251 = vector.broadcast %250 : vector<8x1xf32> to vector<8x32xf32>
    %252 = arith.mulf %242, %251 : vector<8x32xf32>
    %c0_139 = arith.constant 0 : index
    %c0_140 = arith.constant 0 : index
    %253 = vector.load %arg17[%c0_139, %c0_140] : memref<1x32xf32, #tpu.memory_space<vmem>>, vector<1x32xf32>
    %254 = vector.broadcast %253 : vector<1x32xf32> to vector<8x32xf32>
    %255 = arith.mulf %252, %254 : vector<8x32xf32>
    %c0_141 = arith.constant 0 : index
    %c0_142 = arith.constant 0 : index
    %256 = vector.load %arg18[%c0_141, %c0_142] : memref<1x32xf32, #tpu.memory_space<vmem>>, vector<1x32xf32>
    %257 = vector.broadcast %256 : vector<1x32xf32> to vector<8x32xf32>
    %258 = arith.addf %255, %257 : vector<8x32xf32>
    %c0_143 = arith.constant 0 : index
    %c0_144 = arith.constant 0 : index
    %c0_145 = arith.constant 0 : index
    %259 = vector.load %arg21[%c0_143, %c0_144, %c0_145] : memref<1x8x32xf32, #tpu.memory_space<vmem>>, vector<1x8x32xf32>
    %260 = vector.shape_cast %259 : vector<1x8x32xf32> to vector<8x32xf32>
    %261 = vector.shape_cast %258 : vector<8x32xf32> to vector<1x8x32xf32>
    tpu.vector_store %arg21[%c0_143, %c0_144, %c0_145], %261 {strides = array<i32>} : memref<1x8x32xf32, #tpu.memory_space<vmem>>, vector<1x8x32xf32>,
    return
  }
  func.func @transform_0(%arg0: i32) -> (i32, i32, i32) {
    %c0_i32 = arith.constant 0 : i32
    %c0_i32_0 = arith.constant 0 : i32
    %c0_i32_1 = arith.constant 0 : i32
    return %arg0, %c0_i32, %c0_i32_0 : i32, i32, i32
  }
  func.func @transform_1(%arg0: i32) -> (i32, i32, i32) {
    %c0_i32 = arith.constant 0 : i32
    %c0_i32_0 = arith.constant 0 : i32
    %c0_i32_1 = arith.constant 0 : i32
    return %arg0, %c0_i32, %c0_i32_0 : i32, i32, i32
  }
  func.func @transform_2(%arg0: i32) -> (i32, i32) {
    %c0_i32 = arith.constant 0 : i32
    %c0_i32_0 = arith.constant 0 : i32
    %c0_i32_1 = arith.constant 0 : i32
    return %c0_i32, %c0_i32_0 : i32, i32
  }
  func.func @transform_3(%arg0: i32) -> (i32, i32) {
    %c0_i32 = arith.constant 0 : i32
    %c0_i32_0 = arith.constant 0 : i32
    %c0_i32_1 = arith.constant 0 : i32
    return %c0_i32, %c0_i32_0 : i32, i32
  }
  func.func @transform_4(%arg0: i32) -> (i32, i32) {
    %c0_i32 = arith.constant 0 : i32
    %c0_i32_0 = arith.constant 0 : i32
    %c0_i32_1 = arith.constant 0 : i32
    return %c0_i32, %c0_i32_0 : i32, i32
  }
  func.func @transform_5(%arg0: i32) -> (i32, i32) {
    %c0_i32 = arith.constant 0 : i32
    %c0_i32_0 = arith.constant 0 : i32
    %c0_i32_1 = arith.constant 0 : i32
    return %c0_i32, %c0_i32_0 : i32, i32
  }
  func.func @transform_6(%arg0: i32) -> (i32, i32) {
    %c0_i32 = arith.constant 0 : i32
    %c0_i32_0 = arith.constant 0 : i32
    %c0_i32_1 = arith.constant 0 : i32
    return %c0_i32, %c0_i32_0 : i32, i32
  }
  func.func @transform_7(%arg0: i32) -> (i32, i32) {
    %c0_i32 = arith.constant 0 : i32
    %c0_i32_0 = arith.constant 0 : i32
    %c0_i32_1 = arith.constant 0 : i32
    return %c0_i32, %c0_i32_0 : i32, i32
  }
  func.func @transform_8(%arg0: i32) -> (i32, i32) {
    %c0_i32 = arith.constant 0 : i32
    %c0_i32_0 = arith.constant 0 : i32
    %c0_i32_1 = arith.constant 0 : i32
    return %c0_i32, %c0_i32_0 : i32, i32
  }
  func.func @transform_9(%arg0: i32) -> (i32, i32) {
    %c0_i32 = arith.constant 0 : i32
    %c0_i32_0 = arith.constant 0 : i32
    %c0_i32_1 = arith.constant 0 : i32
    return %c0_i32, %c0_i32_0 : i32, i32
  }
  func.func @transform_10(%arg0: i32) -> (i32, i32) {
    %c0_i32 = arith.constant 0 : i32
    %c0_i32_0 = arith.constant 0 : i32
    %c0_i32_1 = arith.constant 0 : i32
    return %c0_i32, %c0_i32_0 : i32, i32
  }
  func.func @transform_11(%arg0: i32) -> (i32, i32) {
    %c0_i32 = arith.constant 0 : i32
    %c0_i32_0 = arith.constant 0 : i32
    %c0_i32_1 = arith.constant 0 : i32
    return %c0_i32, %c0_i32_0 : i32, i32
  }
  func.func @transform_12(%arg0: i32) -> (i32, i32) {
    %c0_i32 = arith.constant 0 : i32
    %c0_i32_0 = arith.constant 0 : i32
    %c0_i32_1 = arith.constant 0 : i32
    return %c0_i32, %c0_i32_0 : i32, i32
  }
  func.func @transform_13(%arg0: i32) -> (i32, i32) {
    %c0_i32 = arith.constant 0 : i32
    %c0_i32_0 = arith.constant 0 : i32
    %c0_i32_1 = arith.constant 0 : i32
    return %c0_i32, %c0_i32_0 : i32, i32
  }
  func.func @transform_14(%arg0: i32) -> (i32, i32) {
    %c0_i32 = arith.constant 0 : i32
    %c0_i32_0 = arith.constant 0 : i32
    %c0_i32_1 = arith.constant 0 : i32
    return %c0_i32, %c0_i32_0 : i32, i32
  }
  func.func @transform_15(%arg0: i32) -> (i32, i32) {
    %c0_i32 = arith.constant 0 : i32
    %c0_i32_0 = arith.constant 0 : i32
    %c0_i32_1 = arith.constant 0 : i32
    return %c0_i32, %c0_i32_0 : i32, i32
  }
  func.func @transform_16(%arg0: i32) -> (i32, i32) {
    %c0_i32 = arith.constant 0 : i32
    %c0_i32_0 = arith.constant 0 : i32
    %c0_i32_1 = arith.constant 0 : i32
    return %c0_i32, %c0_i32_0 : i32, i32
  }
  func.func @transform_17(%arg0: i32) -> (i32, i32) {
    %c0_i32 = arith.constant 0 : i32
    %c0_i32_0 = arith.constant 0 : i32
    %c0_i32_1 = arith.constant 0 : i32
    return %c0_i32, %c0_i32_0 : i32, i32
  }
  func.func @transform_18(%arg0: i32) -> (i32, i32) {
    %c0_i32 = arith.constant 0 : i32
    %c0_i32_0 = arith.constant 0 : i32
    %c0_i32_1 = arith.constant 0 : i32
    return %c0_i32, %c0_i32_0 : i32, i32
  }
  func.func @transform_19(%arg0: i32) -> (i32, i32) {
    %c0_i32 = arith.constant 0 : i32
    %c0_i32_0 = arith.constant 0 : i32
    %c0_i32_1 = arith.constant 0 : i32
    return %c0_i32, %c0_i32_0 : i32, i32
  }
  func.func @transform_20(%arg0: i32) -> (i32, i32, i32) {
    %c0_i32 = arith.constant 0 : i32
    %c0_i32_0 = arith.constant 0 : i32
    %c0_i32_1 = arith.constant 0 : i32
    return %arg0, %c0_i32, %c0_i32_0 : i32, i32, i32
  }
  func.func @transform_21(%arg0: i32) -> (i32, i32, i32, i32) {
    %c0_i32 = arith.constant 0 : i32
    %c0_i32_0 = arith.constant 0 : i32
    %c0_i32_1 = arith.constant 0 : i32
    %c0_i32_2 = arith.constant 0 : i32
    return %arg0, %c0_i32, %c0_i32_0, %c0_i32_1 : i32, i32, i32, i32
  }
  func.func @transform_22(%arg0: i32) -> (i32, i32, i32, i32) {
    %c0_i32 = arith.constant 0 : i32
    %c0_i32_0 = arith.constant 0 : i32
    %c0_i32_1 = arith.constant 0 : i32
    %c0_i32_2 = arith.constant 0 : i32
    return %arg0, %c0_i32, %c0_i32_0, %c0_i32_1 : i32, i32, i32, i32
  }
}

</mosaic_0001>

<bundles_post_ra>
// kernel: tpu_custom_call.1
= control target key start
LH: loop header
LB: loop body
LE: loop exit
PB: predicated region body
PF: predicated region fallthrough
CT: control target
= control target key end

     0   :  { %s5551_s0 = inlined_call_operand.hbm [shape: f32[2,8,32], index: 0, kind: input, shape index: {}]   ;;  %s5552_s1 = inlined_call_operand.hbm [shape: f32[2,8,32], index: 1, kind: input, shape index: {}]   ;;  %s5553_s2 = inlined_call_operand.vmem [shape: f32[32,96], index: 2, kind: input, shape index: {}]   ;;  %s5554_s3 = inlined_call_operand.hbm [shape: f32[1,96], index: 3, kind: input, shape index: {}]   ;;  %s5555_s4 = inlined_call_operand.vmem [shape: f32[32,32], index: 4, kind: input, shape index: {}]   ;;  %s5556_s5 = inlined_call_operand.hbm [shape: f32[1,32], index: 5, kind: input, shape index: {}]   ;;  %s5557_s6 = inlined_call_operand.vmem [shape: f32[32,32], index: 6, kind: input, shape index: {}]   ;;  %s5558_s7 = inlined_call_operand.hbm [shape: f32[1,32], index: 7, kind: input, shape index: {}]   ;;  %s5559_s8 = inlined_call_operand.hbm [shape: f32[32,64], index: 8, kind: input, shape index: {}]   ;;  %s5560_s9 = inlined_call_operand.hbm [shape: f32[1,64], index: 9, kind: input, shape index: {}]   ;;  %s5561_s10 = inlined_call_operand.vmem [shape: f32[32,32], index: 10, kind: input, shape index: {}]   ;;  %s5562_s11 = inlined_call_operand.hbm [shape: f32[1,32], index: 11, kind: input, shape index: {}]   ;;  %s5563_s12 = inlined_call_operand.hbm [shape: f32[1,32], index: 12, kind: input, shape index: {}]   ;;  %s5564_s13 = inlined_call_operand.hbm [shape: f32[1,32], index: 13, kind: input, shape index: {}]   ;;  %s5565_s14 = inlined_call_operand.hbm [shape: f32[1,32], index: 14, kind: input, shape index: {}]   ;;  %s5566_s15 = inlined_call_operand.hbm [shape: f32[1,32], index: 15, kind: input, shape index: {}]   ;;  %s5567_s16 = inlined_call_operand.hbm [shape: f32[1,32], index: 16, kind: input, shape index: {}]   ;;  %s5568_s17 = inlined_call_operand.hbm [shape: f32[1,32], index: 17, kind: input, shape index: {}]   ;;  %s5569_s18 = inlined_call_operand.hbm [shape: f32[32,64], index: 18, kind: input, shape index: {}]   ;;  %s5570_s19 = inlined_call_operand.vmem [shape: f32[64,32], index: 19, kind: input, shape index: {}]   ;;  %s5571_s20 = inlined_call_operand.hbm [shape: f32[2,8,32], index: 20, kind: output, shape index: {0}]   ;;  %s5572_s21 = inlined_call_operand.hbm [shape: f32[2,4,8,8], index: 21, kind: output, shape index: {1}]   ;;  %s5573_s22 = inlined_call_operand.hbm [shape: f32[2,4,8,8], index: 22, kind: output, shape index: {2}]  }
   0x1   :  { %5617 = sst [smem:[#allocation46_spill]] %s5551_s0 }
   0x2   :  { %5618 = sst [smem:[#allocation47_spill]] %s5552_s1 }
   0x3   :  { %5619 = sst [smem:[#allocation48_spill]] %s5553_s2 }
   0x4   :  { %5620 = sst [smem:[#allocation49_spill]] %s5554_s3 }
   0x5   :  { %5621 = sst [smem:[#allocation50_spill]] %s5555_s4 }
   0x6   :  { %5622 = sst [smem:[#allocation51_spill]] %s5556_s5 }
   0x7   :  { %5623 = sst [smem:[#allocation52_spill]] %s5557_s6 }
   0x8   :  { %5624 = sst [smem:[#allocation53_spill]] %s5558_s7 }
   0x9   :  { %5625 = sst [smem:[#allocation54_spill]] %s5559_s8 }
   0xa   :  { %5626 = sst [smem:[#allocation55_spill]] %s5560_s9 }
   0xb   :  { %5627 = sst [smem:[#allocation56_spill]] %s5561_s10 }
   0xc   :  { %5628 = sst [smem:[#allocation57_spill]] %s5562_s11 }
   0xd   :  { %5629 = sst [smem:[#allocation58_spill]] %s5563_s12 }
   0xe   :  { %5630 = sst [smem:[#allocation59_spill]] %s5564_s13 }
   0xf   :  { %5631 = sst [smem:[#allocation60_spill]] %s5565_s14 }
  0x10   :  { %5632 = sst [smem:[#allocation61_spill]] %s5566_s15 }
  0x11   :  { %5633 = sst [smem:[#allocation62_spill]] %s5570_s19 }
  0x12   :  { %5634 = sst [smem:[#allocation63_spill]] %s5571_s20 }
  0x13   :  { %5635 = sst [smem:[#allocation64_spill]] %s5572_s21 }
  0x14   :  { %5636 = sst [smem:[#allocation65_spill]] %s5573_s22 }
  0x15   :  { %28 = vsyncpa [#allocation4], 0 }
  0x16   :  { %30 = vsyncpa [#allocation4 + $0x1], 0 }
  0x17   :  { %31 = vsyncpa [#allocation7], 0 }
  0x18   :  { %33 = vsyncpa [#allocation7 + $0x1], 0 }
  0x19   :  { %34 = vsyncpa [#allocation10], 0 }
  0x1a   :  { %35 = vsyncpa [#allocation13], 0 }
  0x1b   :  { %36 = vsyncpa [#allocation16], 0 }
  0x1c   :  { %37 = vsyncpa [#allocation19], 0 }
  0x1d   :  { %38 = vsyncpa [#allocation22], 0 }
  0x1e   :  { %39 = vsyncpa [#allocation25], 0 }
  0x1f   :  { %40 = vsyncpa [#allocation5], 0 }
  0x20   :  { %42 = vsyncpa [#allocation5 + $0x1], 0 }
  0x21   :  { %43 = vsyncpa [#allocation29], 0 }
  0x22   :  { %45 = vsyncpa [#allocation29 + $0x1], 0  ;;  %s4670_s3 = smov 0   ;;  %s4672_s28 = smov 0  }
  0x23   :  { %s4674_s29 = smov 0   ;;  %s4676_s30 = smov 0  }
  0x24 LB: > { %5637 = sst [smem:[#allocation42_spill]] %s4503_s3  ;;  %s4517_s4 = smov [#allocation8]   ;;  %s4515_s30 = sphi %s4676_s30, %s5711_s30   ;;  %s4511_s29 = sphi %s4674_s29, %s5710_s29   ;;  %s4507_s28 = sphi %s4672_s28, %s5709_s28   ;;  %s4503_s3 = sphi %s4670_s3, %s5708_s3  }
  0x25   : > { %5638 = sst [smem:[#allocation43_spill]] %s4507_s28  ;;  %s580_s0 = sshll.u32 %s4517_s4, 4  ;;  %s4696_s0 = int_to_ptr.vmem [resolvable:$true] %s580_s0 }
  0x26   : > { %s4691_s23 = sadd.s32 4294967295, %s4515_s30   ;;  %p3301_p0 = scmp.ge.s32.totalorder %s4515_s30, 1 }
  0x27   : > { %5639 = sst [smem:[#allocation44_spill]] %s4691_s23  ;;  %p5593_p1 = scmp.eq.s32.totalorder %s4691_s23, 0 }
  0x28   : > { %p564_p2 = scmp.lt.s32.totalorder %s4515_s30, 3  ;;  %s4518_s5 = smov [#allocation9]  }
  0x29   : > { %s594_s24 = sshll.u32 %s4518_s5, 4  ;;  %s4519_s6 = smov [#allocation12]   ;;  %s4705_s24 = int_to_ptr.vmem [resolvable:$true] %s594_s24 }
  0x2a   : > { %p4698_p3 = pnand %p3301_p0, %p564_p2  ;;  %s618_s25 = sshll.u32 %s4519_s6, 4  ;;  %s4713_s25 = int_to_ptr.vmem [resolvable:$true] %s618_s25 }
  0x2b   : > { %s5643_s4 = sld [smem:[#allocation49_spill]] }
  0x2c   : > { %s5640_s1 = scalar_select %p4698_p3, 1, 0 }
  0x2d   : > { %p3745_p5 = pneg %p4698_p3 }
  0x2e   : > { %5641 = sst [smem:[#allocation45_spill]] %s5640_s1 }
  0x2f   : > { %p4709_p6 = pnand %p3745_p5, %p5593_p1 }
  0x31   : > { %s3933_s20 = scalar_lea.hbm %s5643_s4, 16  ;;  %p4723_p8 = pneg %p4709_p6 }
  0x32   : > { %p3934_p7 = scmp.ne.s32.totalorder %s5643_s4, %s3933_s20  ;;  %p3940_p11 = scmp.lt.u32.totalorder %s3933_s20, %s5643_s4 }
  0x34   : > { %p3936_p9 = pnand %p4723_p8, %p3934_p7 }
  0x36   : > { %p3937_p10 = pneg %p3936_p9 }
  0x38   : > { %p3942_p12 = pnand %p3940_p11, %p3937_p10 }
  0x3a   : > { %3945 = shalt.err (!%p3942_p12)
}
  0x3b   : > { %s3946_s21 = scalar_lea.vmem %s4696_s0, 16  ;;  %s3953_s22 = scalar_lea.vmem %s4696_s0, 32 }
  0x3c   : > { %p3947_p13 = scmp.ne.s32.totalorder %s4696_s0, %s3946_s21  ;;  %p3954_p5 = scmp.lt.s32.totalorder %s4696_s0, %s4696_s0 }
  0x3d   : > { %p3955_p7 = scmp.lt.s32.totalorder %s3953_s22, %s3946_s21 }
  0x3e   : > { %p3949_p0 = pnand %p3947_p13, %p4723_p8 }
  0x3f   : > { %p3956_p9 = por %p3955_p7, %p3954_p5 }
  0x40   : > { %p3950_p2 = pneg %p3949_p0 }
  0x42   : > { %p3957_p4 = pnand %p3956_p9, %p3950_p2 }
  0x44   : > { %3960 = shalt.err (!%p3957_p4)
}
  0x45   : > { %3748 = dma.hbm_to_vmem [thread:$0]  (!%p4709_p6), %s5643_s4, 16, %s4696_s0, [#allocation7]  }
  0x46   : > { %s5645_s6 = sld [smem:[#allocation51_spill]] }
  0x4c   : > { %s3961_s10 = scalar_lea.hbm %s5645_s6, 16 }
  0x4d   : > { %p3962_p10 = scmp.ne.s32.totalorder %s5645_s6, %s3961_s10  ;;  %p3968_p4 = scmp.lt.u32.totalorder %s3961_s10, %s5645_s6 }
  0x4f   : > { %p3964_p11 = pnand %p3962_p10, %p4723_p8 }
  0x51   : > { %p3965_p12 = pneg %p3964_p11 }
  0x53   : > { %p3970_p13 = pnand %p3968_p4, %p3965_p12 }
  0x55   : > { %3973 = shalt.err (!%p3970_p13)
}
  0x56   : > { %s3974_s0 = scalar_lea.vmem %s4705_s24, 16  ;;  %s3981_s23 = scalar_lea.vmem %s4705_s24, 32 }
  0x57   : > { %p3975_p0 = scmp.ne.s32.totalorder %s4705_s24, %s3974_s0  ;;  %p3982_p7 = scmp.lt.s32.totalorder %s4705_s24, %s4705_s24 }
  0x58   : > { %p3983_p9 = scmp.lt.s32.totalorder %s3981_s23, %s3974_s0 }
  0x59   : > { %p3977_p2 = pnand %p3975_p0, %p4723_p8 }
  0x5a   : > { %p3984_p10 = por %p3983_p9, %p3982_p7 }
  0x5b   : > { %p3978_p5 = pneg %p3977_p2 }
  0x5d   : > { %p3985_p11 = pnand %p3984_p10, %p3978_p5 }
  0x5f   : > { %3988 = shalt.err (!%p3985_p11)
}
  0x60   : > { %3751 = dma.hbm_to_vmem [thread:$0]  (!%p4709_p6), %s5645_s6, 16, %s4705_s24, [#allocation10]  }
  0x61   : > { %s5646_s8 = sld [smem:[#allocation54_spill]] }
  0x67   : > { %s3989_s2 = scalar_lea.hbm %s5646_s8, 512 }
  0x68   : > { %p3990_p12 = scmp.ne.s32.totalorder %s5646_s8, %s3989_s2  ;;  %p3996_p0 = scmp.lt.u32.totalorder %s3989_s2, %s5646_s8 }
  0x6a   : > { %p3992_p4 = pnand %p3990_p12, %p4723_p8 }
  0x6c   : > { %p3993_p13 = pneg %p3992_p4 }
  0x6e   : > { %p3998_p2 = pnand %p3996_p0, %p3993_p13 }
  0x70   : > { %4001 = shalt.err (!%p3998_p2)
}
  0x71   : > { %s4002_s24 = scalar_lea.vmem %s4713_s25, 512  ;;  %p4010_p10 = scmp.lt.s32.totalorder %s4713_s25, %s4713_s25 }
  0x72   : > { %p4003_p5 = scmp.ne.s32.totalorder %s4713_s25, %s4002_s24  ;;  %p4011_p11 = scmp.lt.s32.totalorder %s4002_s24, %s4002_s24 }
  0x74   : > { %p4005_p7 = pnand %p4003_p5, %p4723_p8  ;;  %p4012_p12 = por %p4011_p11, %p4010_p10 }
  0x76   : > { %p4006_p9 = pneg %p4005_p7 }
  0x78   : > { %p4013_p4 = pnand %p4012_p12, %p4006_p9 }
  0x7a   : > { %4016 = shalt.err (!%p4013_p4)
}
  0x7b   : > { %s4520_s23 = smov 128   ;;  %s4521_s10 = smov 8  }
  0x7c   : > { %3757 = dma.hbm_to_vmem [thread:$0]  (!%p4709_p6), %s5646_s8, 512, %s4713_s25, [#allocation13], %s4520_s23, %s4520_s23, %s4521_s10  }
  0x7d   : > { %s4522_s20 = smov [#allocation15]   ;;  %s4523_s27 = smov [#allocation18]  }
  0x7e   : > { %s646_s2 = sshll.u32 %s4522_s20, 4  ;;  %s668_s21 = sshll.u32 %s4523_s27, 4  ;;  %s647_s2 = int_to_ptr.vmem [resolvable:$true] %s646_s2  ;;  %s669_s21 = int_to_ptr.vmem [resolvable:$true] %s668_s21 }
  0x7f   : > { %s5647_s11 = sld [smem:[#allocation57_spill]] }
  0x85   : > { %s4017_s24 = scalar_lea.hbm %s5647_s11, 16 }
  0x86   : > { %p4018_p13 = scmp.ne.s32.totalorder %s5647_s11, %s4017_s24  ;;  %p4024_p5 = scmp.lt.u32.totalorder %s4017_s24, %s5647_s11 }
  0x88   : > { %p4020_p0 = pnand %p4018_p13, %p4723_p8 }
  0x8a   : > { %p4021_p2 = pneg %p4020_p0 }
  0x8c   : > { %p4026_p7 = pnand %p4024_p5, %p4021_p2 }
  0x8e   : > { %4029 = shalt.err (!%p4026_p7)
}
  0x8f   : > { %s4030_s25 = scalar_lea.vmem %s647_s2, 16  ;;  %s4037_s1 = scalar_lea.vmem %s647_s2, 32 }
  0x90   : > { %p4031_p9 = scmp.ne.s32.totalorder %s647_s2, %s4030_s25  ;;  %p4038_p12 = scmp.lt.s32.totalorder %s647_s2, %s647_s2 }
  0x91   : > { %p4039_p4 = scmp.lt.s32.totalorder %s4037_s1, %s4030_s25 }
  0x92   : > { %p4033_p10 = pnand %p4031_p9, %p4723_p8 }
  0x93   : > { %p4040_p1 = por %p4039_p4, %p4038_p12 }
  0x94   : > { %p4034_p11 = pneg %p4033_p10 }
  0x96   : > { %p4041_p3 = pnand %p4040_p1, %p4034_p11 }
  0x98   : > { %4044 = shalt.err (!%p4041_p3)
}
  0x99   : > { %3763 = dma.hbm_to_vmem [thread:$0]  (!%p4709_p6), %s5647_s11, 16, %s647_s2, [#allocation16]  }
  0x9a   : > { %s5648_s13 = sld [smem:[#allocation59_spill]] }
  0xa0   : > { %s4045_s19 = scalar_lea.hbm %s5648_s13, 16 }
  0xa1   : > { %p4046_p13 = scmp.ne.s32.totalorder %s5648_s13, %s4045_s19  ;;  %p4052_p3 = scmp.lt.u32.totalorder %s4045_s19, %s5648_s13 }
  0xa3   : > { %p4048_p0 = pnand %p4046_p13, %p4723_p8 }
  0xa5   : > { %p4049_p1 = pneg %p4048_p0 }
  0xa7   : > { %p4054_p2 = pnand %p4052_p3, %p4049_p1 }
  0xa9   : > { %4057 = shalt.err (!%p4054_p2)
}
  0xaa   : > { %s4058_s24 = scalar_lea.vmem %s669_s21, 16  ;;  %s4065_s2 = scalar_lea.vmem %s669_s21, 32 }
  0xab   : > { %p4059_p5 = scmp.ne.s32.totalorder %s669_s21, %s4058_s24  ;;  %p4066_p10 = scmp.lt.s32.totalorder %s669_s21, %s669_s21 }
  0xac   : > { %p4067_p11 = scmp.lt.s32.totalorder %s4065_s2, %s4058_s24 }
  0xad   : > { %p4061_p7 = pnand %p4059_p5, %p4723_p8 }
  0xae   : > { %p4068_p12 = por %p4067_p11, %p4066_p10 }
  0xaf   : > { %p4062_p9 = pneg %p4061_p7 }
  0xb1   : > { %p4069_p4 = pnand %p4068_p12, %p4062_p9 }
  0xb3   : > { %4072 = shalt.err (!%p4069_p4)
}
  0xb4   : > { %3769 = dma.hbm_to_vmem [thread:$0]  (!%p4709_p6), %s5648_s13, 16, %s669_s21, [#allocation19]  }
  0xb5   : > { %s4524_s4 = smov [#allocation21]   ;;  %s4525_s3 = smov [#allocation24]  }
  0xb6   : > { %s690_s6 = sshll.u32 %s4524_s4, 4  ;;  %s712_s28 = sshll.u32 %s4525_s3, 4  ;;  %s691_s6 = int_to_ptr.vmem [resolvable:$true] %s690_s6  ;;  %s713_s28 = int_to_ptr.vmem [resolvable:$true] %s712_s28 }
  0xb7   : > { %s5649_s15 = sld [smem:[#allocation61_spill]] }
  0xbd   : > { %s4073_s27 = scalar_lea.hbm %s5649_s15, 16 }
  0xbe   : > { %p4074_p13 = scmp.ne.s32.totalorder %s5649_s15, %s4073_s27  ;;  %p4080_p3 = scmp.lt.u32.totalorder %s4073_s27, %s5649_s15 }
  0xc0   : > { %p4076_p0 = pnand %p4074_p13, %p4723_p8 }
  0xc2   : > { %p4077_p1 = pneg %p4076_p0 }
  0xc4   : > { %p4082_p2 = pnand %p4080_p3, %p4077_p1 }
  0xc6   : > { %4085 = shalt.err (!%p4082_p2)
}
  0xc7   : > { %s4086_s21 = scalar_lea.vmem %s691_s6, 16  ;;  %s4093_s25 = scalar_lea.vmem %s691_s6, 32 }
  0xc8   : > { %p4087_p5 = scmp.ne.s32.totalorder %s691_s6, %s4086_s21  ;;  %p4094_p10 = scmp.lt.s32.totalorder %s691_s6, %s691_s6 }
  0xc9   : > { %p4095_p11 = scmp.lt.s32.totalorder %s4093_s25, %s4086_s21 }
  0xca   : > { %p4089_p7 = pnand %p4087_p5, %p4723_p8 }
  0xcb   : > { %p4096_p12 = por %p4095_p11, %p4094_p10 }
  0xcc   : > { %p4090_p9 = pneg %p4089_p7 }
  0xce   : > { %p4097_p4 = pnand %p4096_p12, %p4090_p9 }
  0xd0   : > { %4100 = shalt.err (!%p4097_p4)
}
  0xd1   : > { %3775 = dma.hbm_to_vmem [thread:$0]  (!%p4709_p6), %s5649_s15, 16, %s691_s6, [#allocation22]  }
  0xd2   : > { %s4101_s20 = scalar_lea.hbm %s5568_s17, 16 }
  0xd3   : > { %p4102_p13 = scmp.ne.s32.totalorder %s5568_s17, %s4101_s20  ;;  %p4108_p3 = scmp.lt.u32.totalorder %s4101_s20, %s5568_s17 }
  0xd5   : > { %p4104_p0 = pnand %p4102_p13, %p4723_p8 }
  0xd7   : > { %p4105_p1 = pneg %p4104_p0 }
  0xd9   : > { %p4110_p2 = pnand %p4108_p3, %p4105_p1 }
  0xdb   : > { %4113 = shalt.err (!%p4110_p2)
}
  0xdc   : > { %s4114_s2 = scalar_lea.vmem %s713_s28, 16  ;;  %s4121_s6 = scalar_lea.vmem %s713_s28, 32 }
  0xdd   : > { %p4115_p5 = scmp.ne.s32.totalorder %s713_s28, %s4114_s2  ;;  %p4122_p10 = scmp.lt.s32.totalorder %s713_s28, %s713_s28 }
  0xde   : > { %p4123_p11 = scmp.lt.s32.totalorder %s4121_s6, %s4114_s2 }
  0xdf   : > { %p4117_p7 = pnand %p4115_p5, %p4723_p8 }
  0xe0   : > { %p4124_p12 = por %p4123_p11, %p4122_p10 }
  0xe1   : > { %p4118_p9 = pneg %p4117_p7 }
  0xe3   : > { %p4125_p4 = pnand %p4124_p12, %p4118_p9 }
  0xe5   : > { %4128 = shalt.err (!%p4125_p4)
}
  0xe6   : > { %3781 = dma.hbm_to_vmem [thread:$0]  (!%p4709_p6), %s5568_s17, 16, %s713_s28, [#allocation25]  }
  0xe7   : > { %s4526_s1 = smov [#allocation11]   ;;  %s4527_s3 = smov [#allocation14]  }
  0xe8   : > { %s608_s4 = sshll.u32 %s4526_s1, 4  ;;  %s632_s19 = sshll.u32 %s4527_s3, 4  ;;  %s609_s4 = int_to_ptr.vmem [resolvable:$true] %s608_s4  ;;  %s633_s19 = int_to_ptr.vmem [resolvable:$true] %s632_s19 }
  0xe9   : > { %s5650_s7 = sld [smem:[#allocation53_spill]] }
  0xef   : > { %s4129_s22 = scalar_lea.hbm %s5650_s7, 16 }
  0xf0   : > { %p4130_p13 = scmp.ne.s32.totalorder %s5650_s7, %s4129_s22  ;;  %p4136_p3 = scmp.lt.u32.totalorder %s4129_s22, %s5650_s7 }
  0xf2   : > { %p4132_p0 = pnand %p4130_p13, %p4723_p8 }
  0xf4   : > { %p4133_p1 = pneg %p4132_p0 }
  0xf6   : > { %p4138_p2 = pnand %p4136_p3, %p4133_p1 }
  0xf8   : > { %4141 = shalt.err (!%p4138_p2)
}
  0xf9   : > { %s4142_s28 = scalar_lea.vmem %s609_s4, 16  ;;  %s4149_s21 = scalar_lea.vmem %s609_s4, 32 }
  0xfa   : > { %p4143_p5 = scmp.ne.s32.totalorder %s609_s4, %s4142_s28  ;;  %p4150_p10 = scmp.lt.s32.totalorder %s609_s4, %s609_s4 }
  0xfb   : > { %p4151_p11 = scmp.lt.s32.totalorder %s4149_s21, %s4142_s28 }
  0xfc   : > { %p4145_p7 = pnand %p4143_p5, %p4723_p8 }
  0xfd   : > { %p4152_p12 = por %p4151_p11, %p4150_p10 }
  0xfe   : > { %p4146_p9 = pneg %p4145_p7 }
 0x100   : > { %p4153_p4 = pnand %p4152_p12, %p4146_p9 }
 0x102   : > { %4156 = shalt.err (!%p4153_p4)
}
 0x103   : > { %3754 = dma.hbm_to_vmem [thread:$0]  (!%p4709_p6), %s5650_s7, 16, %s609_s4, [#allocation10]  }
 0x104   : > { %s5651_s9 = sld [smem:[#allocation55_spill]] }
 0x10a   : > { %s4157_s27 = scalar_lea.hbm %s5651_s9, 16 }
 0x10b   : > { %p4158_p13 = scmp.ne.s32.totalorder %s5651_s9, %s4157_s27  ;;  %p4164_p3 = scmp.lt.u32.totalorder %s4157_s27, %s5651_s9 }
 0x10d   : > { %p4160_p0 = pnand %p4158_p13, %p4723_p8 }
 0x10f   : > { %p4161_p1 = pneg %p4160_p0 }
 0x111   : > { %p4166_p2 = pnand %p4164_p3, %p4161_p1 }
 0x113   : > { %4169 = shalt.err (!%p4166_p2)
}
 0x114   : > { %s4170_s6 = scalar_lea.vmem %s633_s19, 16  ;;  %s4177_s4 = scalar_lea.vmem %s633_s19, 32 }
 0x115   : > { %p4171_p5 = scmp.ne.s32.totalorder %s633_s19, %s4170_s6  ;;  %p4178_p10 = scmp.lt.s32.totalorder %s633_s19, %s633_s19 }
 0x116   : > { %p4179_p11 = scmp.lt.s32.totalorder %s4177_s4, %s4170_s6 }
 0x117   : > { %p4173_p7 = pnand %p4171_p5, %p4723_p8 }
 0x118   : > { %p4180_p12 = por %p4179_p11, %p4178_p10 }
 0x119   : > { %p4174_p9 = pneg %p4173_p7 }
 0x11b   : > { %p4181_p4 = pnand %p4180_p12, %p4174_p9 }
 0x11d   : > { %4184 = shalt.err (!%p4181_p4)
}
 0x11e   : > { %3760 = dma.hbm_to_vmem [thread:$0]  (!%p4709_p6), %s5651_s9, 16, %s633_s19, [#allocation13]  }
 0x11f   : > { %s4528_s25 = smov [#allocation17]   ;;  %s4529_s3 = smov [#allocation20]  }
 0x120   : > { %s657_s1 = sshll.u32 %s4528_s25, 4  ;;  %s679_s20 = sshll.u32 %s4529_s3, 4  ;;  %s658_s1 = int_to_ptr.vmem [resolvable:$true] %s657_s1  ;;  %s680_s20 = int_to_ptr.vmem [resolvable:$true] %s679_s20 }
 0x121   : > { %s5652_s12 = sld [smem:[#allocation58_spill]] }
 0x127   : > { %s4185_s0 = scalar_lea.hbm %s5652_s12, 16 }
 0x128   : > { %p4186_p13 = scmp.ne.s32.totalorder %s5652_s12, %s4185_s0  ;;  %p4192_p3 = scmp.lt.u32.totalorder %s4185_s0, %s5652_s12 }
 0x12a   : > { %p4188_p0 = pnand %p4186_p13, %p4723_p8 }
 0x12c   : > { %p4189_p1 = pneg %p4188_p0 }
 0x12e   : > { %p4194_p2 = pnand %p4192_p3, %p4189_p1 }
 0x130   : > { %4197 = shalt.err (!%p4194_p2)
}
 0x131   : > { %s4198_s19 = scalar_lea.vmem %s658_s1, 16  ;;  %s4205_s28 = scalar_lea.vmem %s658_s1, 32 }
 0x132   : > { %p4199_p5 = scmp.ne.s32.totalorder %s658_s1, %s4198_s19  ;;  %p4206_p10 = scmp.lt.s32.totalorder %s658_s1, %s658_s1 }
 0x133   : > { %p4207_p11 = scmp.lt.s32.totalorder %s4205_s28, %s4198_s19 }
 0x134   : > { %p4201_p7 = pnand %p4199_p5, %p4723_p8 }
 0x135   : > { %p4208_p12 = por %p4207_p11, %p4206_p10 }
 0x136   : > { %p4202_p9 = pneg %p4201_p7 }
 0x138   : > { %p4209_p4 = pnand %p4208_p12, %p4202_p9 }
 0x13a   : > { %4212 = shalt.err (!%p4209_p4)
}
 0x13b   : > { %3766 = dma.hbm_to_vmem [thread:$0]  (!%p4709_p6), %s5652_s12, 16, %s658_s1, [#allocation16]  }
 0x13c   : > { %s5653_s14 = sld [smem:[#allocation60_spill]] }
 0x142   : > { %s4213_s22 = scalar_lea.hbm %s5653_s14, 16 }
 0x143   : > { %p4214_p13 = scmp.ne.s32.totalorder %s5653_s14, %s4213_s22  ;;  %p4220_p3 = scmp.lt.u32.totalorder %s4213_s22, %s5653_s14 }
 0x145   : > { %p4216_p0 = pnand %p4214_p13, %p4723_p8 }
 0x147   : > { %p4217_p1 = pneg %p4216_p0 }
 0x149   : > { %p4222_p2 = pnand %p4220_p3, %p4217_p1 }
 0x14b   : > { %4225 = shalt.err (!%p4222_p2)
}
 0x14c   : > { %s4226_s4 = scalar_lea.vmem %s680_s20, 16  ;;  %s4233_s1 = scalar_lea.vmem %s680_s20, 32 }
 0x14d   : > { %p4227_p5 = scmp.ne.s32.totalorder %s680_s20, %s4226_s4  ;;  %p4234_p10 = scmp.lt.s32.totalorder %s680_s20, %s680_s20 }
 0x14e   : > { %p4235_p11 = scmp.lt.s32.totalorder %s4233_s1, %s4226_s4 }
 0x14f   : > { %p4229_p7 = pnand %p4227_p5, %p4723_p8 }
 0x150   : > { %p4236_p12 = por %p4235_p11, %p4234_p10 }
 0x151   : > { %p4230_p9 = pneg %p4229_p7 }
 0x153   : > { %p4237_p4 = pnand %p4236_p12, %p4230_p9 }
 0x155   : > { %4240 = shalt.err (!%p4237_p4)
}
 0x156   : > { %3772 = dma.hbm_to_vmem [thread:$0]  (!%p4709_p6), %s5653_s14, 16, %s680_s20, [#allocation19]  }
 0x157   : > { %s4530_s21 = smov [#allocation23]   ;;  %s4531_s3 = smov [#allocation26]  }
 0x158   : > { %s701_s25 = sshll.u32 %s4530_s21, 4  ;;  %s722_s27 = sshll.u32 %s4531_s3, 4  ;;  %s702_s25 = int_to_ptr.vmem [resolvable:$true] %s701_s25  ;;  %s723_s27 = int_to_ptr.vmem [resolvable:$true] %s722_s27 }
 0x159   : > { %s4241_s24 = scalar_lea.hbm %s5567_s16, 16 }
 0x15a   : > { %p4242_p13 = scmp.ne.s32.totalorder %s5567_s16, %s4241_s24  ;;  %p4248_p3 = scmp.lt.u32.totalorder %s4241_s24, %s5567_s16 }
 0x15c   : > { %p4244_p0 = pnand %p4242_p13, %p4723_p8 }
 0x15e   : > { %p4245_p1 = pneg %p4244_p0 }
 0x160   : > { %p4250_p2 = pnand %p4248_p3, %p4245_p1 }
 0x162   : > { %4253 = shalt.err (!%p4250_p2)
}
 0x163   : > { %s4254_s20 = scalar_lea.vmem %s702_s25, 16  ;;  %s4261_s19 = scalar_lea.vmem %s702_s25, 32 }
 0x164   : > { %p4255_p5 = scmp.ne.s32.totalorder %s702_s25, %s4254_s20  ;;  %p4262_p10 = scmp.lt.s32.totalorder %s702_s25, %s702_s25 }
 0x165   : > { %p4263_p11 = scmp.lt.s32.totalorder %s4261_s19, %s4254_s20 }
 0x166   : > { %p4257_p7 = pnand %p4255_p5, %p4723_p8 }
 0x167   : > { %p4264_p12 = por %p4263_p11, %p4262_p10 }
 0x168   : > { %p4258_p9 = pneg %p4257_p7 }
 0x16a   : > { %p4265_p4 = pnand %p4264_p12, %p4258_p9 }
 0x16c   : > { %4268 = shalt.err (!%p4265_p4)
}
 0x16d   : > { %3778 = dma.hbm_to_vmem [thread:$0]  (!%p4709_p6), %s5567_s16, 16, %s702_s25, [#allocation22]  }
 0x16e   : > { %s4269_s0 = scalar_lea.hbm %s5569_s18, 512 }
 0x16f   : > { %p4270_p13 = scmp.ne.s32.totalorder %s5569_s18, %s4269_s0  ;;  %p4276_p3 = scmp.lt.u32.totalorder %s4269_s0, %s5569_s18 }
 0x171   : > { %p4272_p0 = pnand %p4270_p13, %p4723_p8 }
 0x173   : > { %p4273_p1 = pneg %p4272_p0 }
 0x175   : > { %p4278_p2 = pnand %p4276_p3, %p4273_p1 }
 0x177   : > { %4281 = shalt.err (!%p4278_p2)
}
 0x178   : > { %s4282_s1 = scalar_lea.vmem %s723_s27, 512  ;;  %p4290_p10 = scmp.lt.s32.totalorder %s723_s27, %s723_s27 }
 0x179   : > { %p4283_p5 = scmp.ne.s32.totalorder %s723_s27, %s4282_s1  ;;  %p4291_p11 = scmp.lt.s32.totalorder %s4282_s1, %s4282_s1 }
 0x17b   : > { %p4285_p7 = pnand %p4283_p5, %p4723_p8  ;;  %p4292_p12 = por %p4291_p11, %p4290_p10 }
 0x17d   : > { %p4286_p9 = pneg %p4285_p7 }
 0x17f   : > { %p4293_p4 = pnand %p4292_p12, %p4286_p9 }
 0x181   : > { %4296 = shalt.err (!%p4293_p4)
}
 0x182   : > { %s5654_s5 = sld [smem:[#allocation43_spill]]  ;;  %s5655_s19 = sld [smem:[#allocation42_spill]] }
 0x183   : > { %s5656_s28 = sld [smem:[#allocation44_spill]]  ;;  %s5595_s26 = sadd.s32 4294967294, %s4515_s30  }
 0x184   : > { %3784 = dma.hbm_to_vmem [thread:$0]  (!%p4709_p6), %s5569_s18, 512, %s723_s27, [#allocation25], %s4520_s23, %s4520_s23, %s4521_s10  }
 0x185   : > { %s4980_s21 = sadd.s32 1, %s4515_s30   ;;  %s58_s3 = sadd.s32 1, %s4511_s29 }
 0x186   : > { %s55_s22 = ssub.s32 %s4515_s30, %s4980_s21  ;;  %p66_p0 = scmp.eq.s32.totalorder %s4515_s30, 0 }
 0x187   : > { %p56_p13 = scmp.eq.s32.totalorder %s55_s22, 0  ;;  %p505_p9 = scmp.eq.s32.totalorder %s5595_s26, 1 }
 0x188   : > { %p65_p8 = scmp.ne.s32.totalorder %s4511_s29, %s5654_s5  ;;  %p71_p1 = scmp.ne.s32.totalorder %s5654_s5, %s5655_s19 }
 0x189   : > { %p499_p3 = scmp.eq.s32.totalorder %s5656_s28, 1  ;;  %p5657_p5 = scmp.eq.s32.totalorder %s5656_s28, 0 }
 0x18a   : > { %s4992_s0 = scalar_select %p56_p13, %s4511_s29, %s58_s3  }
 0x18b   : > { %p67_p2 = por %p66_p0, %p65_p8  ;;  %p4996_p7 = por %p5657_p5, %p71_p1 }
 0x18c   : > { %p5000_p6 = por %p499_p3, %p65_p8  ;;  %p3815_p10 = scmp.lt.s32.totalorder %s4515_s30, 2 }
 0x18d   : > { %s5658_s24 = scalar_select %p4996_p7, 1, 0 }
 0x18e   : > { %s5659_s23 = scalar_select %p5000_p6, 1, 0 }
 0x18f   : > { %s739_s10 = sand.u32 1, %s4511_s29   ;;  %p5008_p11 = por %p505_p9, %p71_p1 }
 0x190   : > { %s5012_s2 = sshll.u32 %s739_s10, 3  ;;  %s3317_s6 = sshll.u32 %s4515_s30, 7 }
 0x191   : > { %s5660_s27 = scalar_select %p5008_p11, 1, 0 }
 0x192   : > { %s5661_s25 = sld [smem:[#allocation46_spill]]  ;;  %s743_s5 = scalar_lea.vmem [#allocation3], %s5012_s2 }
 0x193   : > { %s750_s19 = sshll.u32 %s743_s5, 4  ;;  %p5021_p12 = pnand %p3815_p10, %p67_p2  ;;  %s5025_s19 = int_to_ptr.vmem [resolvable:$true] %s750_s19 }
 0x194   : > { %s5663_s26 = sld [smem:[#allocation47_spill]]  ;;  %s740_s1 = scalar_lea.sflag [#allocation4], %s739_s10 }
 0x195   : > { %p4299_p8 = pneg %p5021_p12 }
 0x198   : > { %s5018_s20 = scalar_lea.hbm %s5661_s25, %s3317_s6  ;;  %s4302_s9 = scalar_lea.hbm %s5661_s25, 256 }
 0x199   : > { %s4297_s7 = scalar_lea.hbm %s5018_s20, 128  ;;  %p4303_p1 = scmp.lt.u32.totalorder %s5018_s20, %s5661_s25 }
 0x19a   : > { %s5030_s4 = scalar_lea.hbm %s5663_s26, %s3317_s6  ;;  %p4298_p4 = scmp.ne.s32.totalorder %s5018_s20, %s4297_s7 }
 0x19b   : > { %p4304_p3 = scmp.lt.u32.totalorder %s4302_s9, %s4297_s7  ;;  %p4306_p5 = scmp.lt.u32.totalorder %s4297_s7, %s5018_s20 }
 0x19c   : > { %p4300_p13 = pnand %p4299_p8, %p4298_p4 }
 0x19d   : > { %p4305_p2 = por %p4304_p3, %p4303_p1 }
 0x19e   : > { %p4301_p0 = pneg %p4300_p13 }
 0x19f   : > { %p4307_p9 = por %p4306_p5, %p4305_p2 }
 0x1a1   : > { %p4308_p10 = pnand %p4307_p9, %p4301_p0 }
 0x1a3   : > { %4311 = shalt.err (!%p4308_p10)
}
 0x1a4   : > { %s4312_s10 = scalar_lea.vmem %s5025_s19, 128  ;;  %s4532_s8 = smov [#allocation3]  }
 0x1a5   : > { %p4313_p4 = scmp.ne.s32.totalorder %s5025_s19, %s4312_s10  ;;  %s4317_s6 = sshll.u32 %s4532_s8, 4  ;;  %s4318_s6 = int_to_ptr.vmem [resolvable:$false] %s4317_s6 }
 0x1a6   : > { %s4319_s11 = scalar_lea.vmem %s4318_s6, 256  ;;  %p4320_p6 = scmp.lt.s32.totalorder %s5025_s19, %s4318_s6 }
 0x1a7   : > { %p4315_p13 = pnand %p4313_p4, %p4299_p8  ;;  %p4321_p1 = scmp.lt.s32.totalorder %s4319_s11, %s4312_s10 }
 0x1a9   : > { %p4316_p11 = pneg %p4315_p13  ;;  %p4322_p3 = por %p4321_p1, %p4320_p6 }
 0x1ab   : > { %p4323_p2 = pnand %p4322_p3, %p4316_p11 }
 0x1ad   : > { %4326 = shalt.err (!%p4323_p2)
}
 0x1ae   : > { %3788 = dma.hbm_to_vmem [thread:$0]  (!%p5021_p12), %s5018_s20, 128, %s5025_s19, %s740_s1  }
 0x1af   : > { %s757_s7 = sand.u32 1, %s4515_s30   ;;  %s761_s9 = scalar_lea.vmem [#allocation6], %s5012_s2 }
 0x1b0   : > { %s768_s12 = sshll.u32 %s761_s9, 4  ;;  %s758_s3 = scalar_lea.sflag [#allocation7], %s757_s7  ;;  %s769_s12 = int_to_ptr.vmem [resolvable:$true] %s768_s12 }
 0x1b1   : > { %s4327_s22 = scalar_lea.hbm %s5030_s4, 128  ;;  %s4332_s8 = scalar_lea.hbm %s5663_s26, 256 }
 0x1b2   : > { %p4328_p6 = scmp.ne.s32.totalorder %s5030_s4, %s4327_s22  ;;  %p4333_p5 = scmp.lt.u32.totalorder %s5030_s4, %s5663_s26 }
 0x1b3   : > { %p4334_p9 = scmp.lt.u32.totalorder %s4332_s8, %s4327_s22  ;;  %p4336_p4 = scmp.lt.u32.totalorder %s4327_s22, %s5030_s4 }
 0x1b4   : > { %p4330_p11 = pnand %p4328_p6, %p4299_p8 }
 0x1b5   : > { %p4335_p10 = por %p4334_p9, %p4333_p5 }
 0x1b6   : > { %p4331_p0 = pneg %p4330_p11 }
 0x1b7   : > { %p4337_p13 = por %p4336_p4, %p4335_p10 }
 0x1b9   : > { %p4338_p1 = pnand %p4337_p13, %p4331_p0 }
 0x1bb   : > { %4341 = shalt.err (!%p4338_p1)
}
 0x1bc   : > { %s4342_s2 = scalar_lea.vmem %s769_s12, 128  ;;  %s4533_s20 = smov [#allocation6]  }
 0x1bd   : > { %p4343_p3 = scmp.ne.s32.totalorder %s769_s12, %s4342_s2  ;;  %s4347_s19 = sshll.u32 %s4533_s20, 4  ;;  %s4348_s19 = int_to_ptr.vmem [resolvable:$false] %s4347_s19 }
 0x1be   : > { %s4349_s1 = scalar_lea.vmem %s4348_s19, 256  ;;  %p4350_p11 = scmp.lt.s32.totalorder %s769_s12, %s4348_s19 }
 0x1bf   : > { %p4345_p2 = pnand %p4343_p3, %p4299_p8  ;;  %p4351_p7 = scmp.lt.s32.totalorder %s4349_s1, %s4342_s2 }
 0x1c1   : > { %p4346_p6 = pneg %p4345_p2  ;;  %p4352_p5 = por %p4351_p7, %p4350_p11 }
 0x1c3   : > { %p4353_p9 = pnand %p4352_p5, %p4346_p6 }
 0x1c5   : > { %4356 = shalt.err (!%p4353_p9)
}
 0x1c6   : > { %3791 = dma.hbm_to_vmem [thread:$0]  (!%p5021_p12), %s5030_s4, 128, %s769_s12, %s758_s3  }
 0x1c7   : > { %s5664_s7 = sld [smem:[#allocation45_spill]] }
 0x1cd   : > { %p5665_p0 = scmp.ne.s32.totalorder %s5664_s7, 0 }
 0x1ce   : > { %s5666_s9 = sld [smem:[#allocation43_spill]] (!%p5665_p0)  ;;  %p5667_p7 = scmp.ne.s32.totalorder (!%p5665_p0), %s5658_s24, 0 }
 0x1cf   : > { %777 = sbr.rel (%p5665_p0) target bundleno = 4782 (0x12ae), region = 100 }
 0x1d4   : > { %s5081_s22 = sand.u32 (!%p5665_p0), 1, %s5666_s9  }
 0x1d5   : > { %s5084_s5 = sshll.u32 (!%p5665_p0), %s5081_s22, 3  ;;  %s780_s10 = scalar_lea.sflag (!%p5665_p0), [#allocation4], %s5081_s22 }
 0x1d6   : > { %s783_s8 = scalar_lea.vmem [#allocation3], %s5084_s5 }
 0x1d7   : > { %4458 = dma.done.wait (%p5667_p7), %s780_s10, 128  }
 0x1d8   : > { %4460 = vsyncadd (%p5667_p7), %s780_s10, 4294967168  ;;  %s5668_s28 = sld [smem:[#allocation44_spill]]  ;;  %s792_s3 = scalar_lea.vmem [#allocation6], %s5084_s5 }
 0x1de   : > { %s5598_s4 = sand.u32 1, %s5668_s28  }
 0x1df   : > { %s789_s12 = scalar_lea.sflag [#allocation7], %s5598_s4 }
 0x1e0   : > { %4462 = dma.done.wait (%p5667_p7), %s789_s12, 128  }
 0x1e1   : > { %4464 = vsyncadd (%p5667_p7), %s789_s12, 4294967168  ;;  %p5669_p12 = scmp.eq.s32.totalorder %s5668_s28, 0 }
 0x1e3   : > { %4466 = dma.done.wait (%p5669_p12), [#allocation7], 16   ;;  %p5670_p8 = pmov %p5669_p12 }
 0x1e5   : > { %4468 = vsyncadd (%p5670_p8), [#allocation7], 4294967280  ;;  %p5671_p10 = pmov %p5670_p8 }
 0x1e6   : > { %p5672_p4 = pmov %p5670_p8 }
 0x1e7   : > { %4470 = dma.done.wait (%p5671_p10), [#allocation10], 32  }
 0x1e8   : > { %4472 = vsyncadd (%p5672_p4), [#allocation10], 4294967264  ;;  %p5673_p13 = pmov %p5672_p4 }
 0x1e9   : > { %p5674_p1 = pmov %p5672_p4 }
 0x1ea   : > { %4474 = dma.done.wait (%p5673_p13), [#allocation13], 528  }
 0x1eb   : > { %4476 = vsyncadd (%p5674_p1), [#allocation13], 4294966768  ;;  %p5675_p3 = pmov %p5674_p1 }
 0x1ec   : > { %p5676_p2 = pmov %p5674_p1 }
 0x1ed   : > { %4478 = dma.done.wait (%p5675_p3), [#allocation16], 32  }
 0x1ee   : > { %4480 = vsyncadd (%p5676_p2), [#allocation16], 4294967264  ;;  %p5677_p6 = pmov %p5674_p1 }
 0x1ef   : > { %p5678_p11 = pmov %p5674_p1 }
 0x1f0   : > { %4482 = dma.done.wait (%p5677_p6), [#allocation19], 32  }
 0x1f1   : > { %4484 = vsyncadd (%p5678_p11), [#allocation19], 4294967264  ;;  %p5679_p5 = pmov %p5674_p1 }
 0x1f2   : > { %p5680_p9 = pmov %p5674_p1 }
 0x1f3   : > { %4486 = dma.done.wait (%p5679_p5), [#allocation22], 32  }
 0x1f4   : > { %4488 = vsyncadd (%p5680_p9), [#allocation22], 4294967264  ;;  %p5681_p0 = pmov %p5674_p1 }
 0x1f6   : > { %4490 = dma.done.wait (%p5681_p0), [#allocation25], 528   ;;  %p5682_p7 = pmov %p5681_p0 }
 0x1f7   : > { %v4534_v0 = vmov 0.0|0.0   ;;  %vm4535_vm0 = vmmov 0   ;;  %v4536_v1 = vmov 0.0   ;;  %s5683_s11 = sld [smem:[#allocation48_spill]]  ;;  %v5149_v8 = vld [vmem:[%s783_s8] sm:$0xff]  ;;  %vm933_vm1 = vcmask 261120  }
 0x1f8   : > { %4492 = vsyncadd (%p5682_p7), [#allocation25], 4294966768  ;;  %3635 = vmatprep.subr.bf16.mxu1 %v4534_v0  ;;  %3478 = vmatprep.mubr.msk.f32.mxu1 %vm4535_vm0, %v4536_v1  ;;  %v3339_v9 = vld [vmem:[#allocation8] ss:$0 sm:$0xff]  ;;  %s5603_s10 = smov 96   ;;  %s4538_s8 = smov 120  }
 0x1f9   : > { %3491 = vmatprep.subr.mxu0 %v4536_v1  ;;  %3493 = vmatprep.mubr.msk.f32.mxu0 %vm4535_vm0, %v4536_v1  ;;  %s5600_s12 = smov 88   ;;  %s5602_s24 = smov 80   ;;  %vm1011_vm2 = vcmask 64512   ;;  %vm1347_vm3 = vcmask 130112   ;;  %vm1520_vm4 = vcmask 195712   ;;  %vm1693_vm5 = vcmask 261312  }
 0x1fa   : > { %s5606_s6 = smov 112   ;;  %s5601_s2 = smov 72   ;;  %vm2862_vm6 = vcmask 523264  }
 0x1fb   : > { %s5604_s20 = smov 104   ;;  %s4544_s19 = smov 56  }
 0x1fc   : > { %s4545_s1 = smov 64   ;;  %s4546_s7 = smov 48  }
 0x1fd   : > { %v922_v2 = vld [vmem:[%s5683_s11] sm:$0xff]  ;;  %v923_v3 = vld [vmem:[%s5683_s11 + $0x8] sm:$0xff]  ;;  %v924_v4 = vld [vmem:[%s5683_s11 + $0x10] sm:$0xff]  ;;  %s4547_s9 = smov 40   ;;  %s5609_s4 = smov 16  }
 0x1fe   : > { %v3636_v5 = vpack.c.bf16 %v923_v3, %v922_v2  ;;  %v925_v6 = vld [vmem:[%s5683_s11 + $0x18] sm:$0xff]  ;;  %p5700_p8 = scmp.ne.s32.totalorder %s5659_s23, 0  ;;  %s4551_s13 = smov [#allocation28]  }
 0x1ff   : > { %v3639_v7 = vpack.c.bf16 %v925_v6, %v924_v4  ;;  %s4361_s14 = sshll.u32 %s4551_s13, 4  ;;  %s4362_s14 = int_to_ptr.vmem [resolvable:$false] %s4361_s14 }
 0x200   : > { %3637 = vmatpush3.bf16.msra.mxu1 %v3636_v5 }
 0x201   : > { %3638 = vmatprep.subr.bf16.mxu1 %v4534_v0 }
 0x204   : > { %3640 = vmatpush3.bf16.msra.mxu1 %v3639_v7 }
 0x205   : > { %3481 = vmatprep.subr.mxu1 %v4536_v1 }
 0x207   : > { %3479 = vmatmul.mubr.msk.f32.vlgmr.msra.gmra.mrb[0].mxu1 %vm933_vm1, %v5149_v8 }
 0x208   : > { %3483 = vmatprep.mubr.msk.f32.mxu1 %vm4535_vm0, %v4536_v1 }
 0x2da   : > { %v1003_v10 = vpop.f32.mrb[0].mxu1 }
 0x2db   : > { %v5156_v11 = vadd.f32 %v3339_v9, %v1003_v10  ;;  %v3480_v12 = vpop.f32.mrb[1].mxu1 }
 0x2dd   : > { %1009 = vrot.lane.b32.xlu0 %v5156_v11, %s5603_s10  ;;  %v1007_v13 = vmul.f32 0.35355338, %v5156_v11  ;;  %s5689_s10 = smov 80  }
 0x2df   : > { %1176 = vrot.lane.b32.xlu1 %v1007_v13, %s4538_s8 }
 0x2e1   : > { %1178 = vrot.lane.b32.xlu0 %v5156_v11, %s5600_s12  ;;  %s5608_s12 = smov 24  }
 0x2e3   : > { %1351 = vrot.lane.b32.xlu1 %v5156_v11, %s5602_s24  ;;  %s5690_s24 = smov 72  }
 0x2e5   : > { %1349 = vrot.lane.b32.xlu0 %v1007_v13, %s5606_s6  ;;  %s5685_s6 = sld [smem:[#allocation52_spill]] }
 0x2e7   : > { %1524 = vrot.lane.b32.xlu1 %v5156_v11, %s5601_s2  ;;  %s5691_s2 = smov 88  }
 0x2e9   : > { %1522 = vrot.lane.b32.xlu0 %v1007_v13, %s5604_s20  ;;  %s5692_s20 = sshll.u32 %s5081_s22, 5 }
 0x34f   : > { %v1010_v14 = vpop.permute.xlu0 %1009 }
 0x350   : > { %3482 = vmatpush3.xpose.msk.msra.mxu1 %vm1011_vm2, %v1010_v14 }
 0x351   : > { %v1177_v15 = vpop.permute.xlu1 %1176  ;;  %3486 = vmatprep.subr.mxu1 %v4536_v1 }
 0x353   : > { %v1179_v16 = vpop.permute.xlu0 %1178  ;;  %3484 = vmatmul.mubr.msk.f32.vlgmr.msra.gmra.mrb[2].mxu1 %vm1011_vm2, %v1007_v13 }
 0x354   : > { %3492 = vmatpush3.xpose.msk.msra.mxu0 %vm1011_vm2, %v1179_v16  ;;  %3488 = vmatprep.mubr.msk.f32.mxu1 %vm4535_vm0, %v4536_v1 }
 0x355   : > { %v1352_v17 = vpop.permute.xlu1 %1351  ;;  %3501 = vmatprep.subr.mxu0 %v4536_v1 }
 0x357   : > { %3494 = vmatmul.mubr.msk.f32.vlgmr.msra.gmra.mrb[0].mxu0 %vm1011_vm2, %v1177_v15  ;;  %v1350_v18 = vpop.permute.xlu0 %1349 }
 0x358   : > { %3502 = vmatpush3.xpose.msk.msra.mxu0 %vm1011_vm2, %v1352_v17  ;;  %3503 = vmatprep.mubr.msk.f32.mxu0 %vm4535_vm0, %v4536_v1 }
 0x359   : > { %3511 = vmatprep.subr.mxu0 %v4536_v1  ;;  %v1525_v19 = vpop.permute.xlu1 %1524 }
 0x35b   : > { %3504 = vmatmul.mubr.msk.f32.vlgmr.msra.gmra.mrb[2].mxu0 %vm1011_vm2, %v1350_v18  ;;  %v1523_v20 = vpop.permute.xlu0 %1522 }
 0x35c   : > { %3512 = vmatpush3.xpose.msk.msra.mxu0 %vm1011_vm2, %v1525_v19  ;;  %3513 = vmatprep.mubr.msk.f32.mxu0 %vm4535_vm0, %v4536_v1 }
 0x35d   : > { %3641 = vmatprep.subr.bf16.mxu0 %v4534_v0 }
 0x35f   : > { %3514 = vmatmul.mubr.msk.f32.vlgmr.msra.gmra.mrb[4].mxu0 %vm1011_vm2, %v1523_v20 }
 0x360   : > { %3529 = vmatprep.mubr.msk.f32.mxu0 %vm4535_vm0, %v4536_v1 }
 0x426   : > { %v1083_v21 = vpop.f32.mrb[2].mxu1 }
 0x427   : > { %v3485_v22 = vpop.f32.mrb[3].mxu1  ;;  %v1087_v23 = vsel %vm1011_vm2, %v1083_v21, -inf }
 0x428   : > { %1088 = vmax.xlane.f32.xlu1 %v1087_v23 }
 0x42a   : > { %v1250_v24 = vpop.f32.mrb[0].mxu0 }
 0x42b   : > { %v3495_v25 = vpop.f32.mrb[1].mxu0  ;;  %v1254_v26 = vsel %vm1011_vm2, %v1250_v24, -inf }
 0x42c   : > { %1255 = vmax.xlane.f32.xlu0 %v1254_v26  ;;  %v3356_v26 = vld [vmem:[#allocation9] ss:$0 sm:$0xff] }
 0x42e   : > { %v1423_v27 = vpop.f32.mrb[2].mxu0 }
 0x42f   : > { %v3505_v28 = vpop.f32.mrb[3].mxu0  ;;  %v1427_v29 = vsel %vm1011_vm2, %v1423_v27, -inf }
 0x430   : > { %1428 = vmax.xlane.f32.xlu0 %v1427_v29 }
 0x432   : > { %v1596_v30 = vpop.f32.mrb[4].mxu0 }
 0x433   : > { %v3515_v31 = vpop.f32.mrb[5].mxu0  ;;  %v1600_v32 = vsel %vm1011_vm2, %v1596_v30, -inf }
 0x434   : > { %1601 = vmax.xlane.f32.xlu1 %v1600_v32 }
 0x445   : > { %1267 = vrot.lane.b32.xlu1 %v5156_v11, %s4544_s19  ;;  %s5599_s19 = sshll.u32 %s5081_s22, 5 }
 0x4b5   : > { %v1089_v33 = vpop.xlane.xlu1 %1088 }
 0x4b6   : > { %v1090_v34 = vsub.f32 %v1083_v21, %v1089_v33 }
 0x4b8   : > { %v1091_v35 = vmul.f32 1.442695, %v1090_v34 }
 0x4b9   : > { %v1256_v36 = vpop.xlane.xlu0 %1255 }
 0x4ba   : > { %3895 = vpow2.f32 %v1091_v35  ;;  %v1257_v37 = vsub.f32 %v1250_v24, %v1256_v36 }
 0x4bc   : > { %v1258_v38 = vmul.f32 1.442695, %v1257_v37  ;;  %v1895_v37 = vld [vmem:[#allocation12] sm:$0xff] }
 0x4bd   : > { %v1429_v48 = vpop.xlane.xlu0 %1428 }
 0x4be   : > { %3897 = vpow2.f32 %v1258_v38  ;;  %v1430_v49 = vsub.f32 %v1423_v27, %v1429_v48  ;;  %v1896_v38 = vld [vmem:[#allocation12 + $0x8] sm:$0xff] }
 0x4c0   : > { %v1431_v50 = vmul.f32 1.442695, %v1430_v49 }
 0x4c1   : > { %v1602_v39 = vpop.xlane.xlu1 %1601 }
 0x4c2   : > { %v1603_v40 = vsub.f32 %v1596_v30, %v1602_v39  ;;  %v3654_v39 = vpack.c.bf16 %v1896_v38, %v1895_v37 }
 0x4c4   : > { %v3896_v41 = vpop.eup %3895  ;;  %v1604_v42 = vmul.f32 1.442695, %v1603_v40  ;;  %v1897_v40 = vld [vmem:[#allocation12 + $0x10] sm:$0xff] }
 0x4c5   : > { %v1093_v43 = vsel %vm1011_vm2, %v3896_v41, 0.0  ;;  %v1268_v53 = vpop.permute.xlu1 %1267 }
 0x4c6   : > { %3899 = vpow2.f32 %v1604_v42  ;;  %1094 = vadd.xlane.f32.xlu0 %v1093_v43  ;;  %v921_v42 = vld [vmem:[%s792_s3] sm:$0xff]  ;;  %s5694_s3 = smov 8  }
 0x4c7   : > { %3901 = vpow2.f32 %v1431_v50  ;;  %v1811_v43 = vld [vmem:[%s5685_s6] sm:$0xff] }
 0x4c8   : > { %v3898_v44 = vpop.eup %3897 }
 0x4c9   : > { %v1260_v45 = vsel %vm1011_vm2, %v3898_v44, 0.0 }
 0x4ca   : > { %1261 = vadd.xlane.f32.xlu1 %v1260_v45 }
 0x4d0   : > { %v3900_v46 = vpop.eup %3899 }
 0x4d1   : > { %v1606_v47 = vsel %vm1011_vm2, %v3900_v46, 0.0  ;;  %v3902_v51 = vpop.eup %3901 }
 0x4d2   : > { %1607 = vadd.xlane.f32.xlu1 %v1606_v47  ;;  %v1433_v52 = vsel %vm1011_vm2, %v3902_v51, 0.0  ;;  %v1814_v47 = vld [vmem:[%s5685_s6 + $0x18] sm:$0xff] }
 0x4dc   : > { %1099 = vrot.lane.b32.xlu0 %v5156_v11, %s4545_s1  ;;  %s5206_s1 = scalar_lea.vmem [#allocation28], %s5599_s19  ;;  %s5684_s19 = sld [smem:[#allocation50_spill]] }
 0x4dd   : > { %s3004_s11 = sshll.u32 %s5206_s1, 4  ;;  %s5432_s11 = int_to_ptr.vmem [resolvable:$true] %s3004_s11 }
 0x4de   : > { %p4364_p13 = scmp.lt.s32.totalorder %s5432_s11, %s4362_s14 }
 0x4e2   : > { %v1696_v12 = vld [vmem:[%s5684_s19] sm:$0xff]  ;;  %v1697_v13 = vld [vmem:[%s5684_s19 + $0x8] sm:$0xff]  ;;  %v1698_v15 = vld [vmem:[%s5684_s19 + $0x10] sm:$0xff] }
 0x4e3   : > { %1440 = vrot.lane.b32.xlu1 %v5156_v11, %s4546_s7  ;;  %s5610_s7 = smov 8   ;;  %v3642_v14 = vpack.c.bf16 %v1697_v13, %v1696_v12  ;;  %v1699_v16 = vld [vmem:[%s5684_s19 + $0x18] sm:$0xff] }
 0x4e4   : > { %v3645_v17 = vpack.c.bf16 %v1699_v16, %v1698_v15 }
 0x4e5   : > { %3643 = vmatpush3.bf16.msra.mxu0 %v3642_v14 }
 0x4e6   : > { %3644 = vmatprep.subr.bf16.mxu0 %v4534_v0 }
 0x4e9   : > { %3646 = vmatpush3.bf16.msra.mxu0 %v3645_v17 }
 0x4ea   : > { %3653 = vmatprep.subr.bf16.mxu0 %v4534_v0 }
 0x4fb   : > { %1434 = vadd.xlane.f32.xlu0 %v1433_v52 }
 0x511   : > { %1613 = vrot.lane.b32.xlu0 %v5156_v11, %s4547_s9  ;;  %s5336_s9 = scalar_lea.vmem [#allocation30], %s5692_s20  ;;  %s4357_s20 = scalar_lea.vmem %s5432_s11, 512 }
 0x512   : > { %p4358_p12 = scmp.ne.s32.totalorder %s5432_s11, %s4357_s20 }
 0x514   : > { %p4359_p10 = pnand %p4358_p12, %p5700_p8 }
 0x516   : > { %p4360_p4 = pneg %p4359_p10 }
 0x553   : > { %v1095_v54 = vpop.xlane.xlu0 %1094 }
 0x554   : > { %3903 = vrcp.f32 %v1095_v54 }
 0x557   : > { %v1100_v55 = vpop.permute.xlu0 %1099  ;;  %v1262_v56 = vpop.xlane.xlu1 %1261 }
 0x558   : > { %3905 = vrcp.f32 %v1262_v56  ;;  %3487 = vmatpush3.msra.mxu1 %v1100_v55  ;;  %v3359_v55 = vld [vmem:[#allocation18] ss:$0 sm:$0xff] }
 0x559   : > { %3496 = vmatprep.subr.mxu1 %v4536_v1 }
 0x55e   : > { %v3904_v57 = vpop.eup %3903 }
 0x55f   : > { %v1097_v58 = vmul.f32 %v3904_v57, %v3896_v41  ;;  %v1608_v59 = vpop.xlane.xlu1 %1607  ;;  %v1898_v41 = vld [vmem:[#allocation12 + $0x18] sm:$0xff] }
 0x560   : > { %3907 = vrcp.f32 %v1608_v59 }
 0x561   : > { %1098 = vst.msk [vmem:[%s5206_s1] sm:$0xff] %vm1011_vm2, %v1097_v58  ;;  %3489 = vmatmul.mubr.msk.f32.vlgmr.msra.gmra.mrb[4].mxu1 %vm1011_vm2, %v1097_v58  ;;  %v3362_v58 = vld [vmem:[#allocation14] ss:$0 sm:$0xff] }
 0x562   : > { %v3906_v60 = vpop.eup %3905  ;;  %3497 = vmatpush3.msra.mxu1 %v1268_v53  ;;  %3498 = vmatprep.mubr.msk.f32.mxu1 %vm4535_vm0, %v4536_v1  ;;  %v3358_v53 = vld [vmem:[#allocation17] ss:$0 sm:$0xff] }
 0x563   : > { %v1264_v61 = vmul.f32 %v3906_v60, %v3898_v44  ;;  %v1441_v62 = vpop.permute.xlu1 %1440  ;;  %3506 = vmatprep.subr.mxu1 %v4536_v1  ;;  %v1812_v44 = vld [vmem:[%s5685_s6 + $0x8] sm:$0xff] }
 0x564   : > { %v3648_v45 = vpack.c.bf16 %v1812_v44, %v1811_v43 }
 0x565   : > { %3346 = vst.msk [vmem:[%s5206_s1 + $0x8] sm:$0xff] %vm1011_vm2, %v1264_v61  ;;  %3499 = vmatmul.mubr.msk.f32.vlgmr.msra.gmra.mrb[6].mxu1 %vm1011_vm2, %v1264_v61 }
 0x566   : > { %3507 = vmatpush3.msra.mxu1 %v1441_v62  ;;  %3508 = vmatprep.mubr.msk.f32.mxu1 %vm4535_vm0, %v4536_v1 }
 0x567   : > { %3516 = vmatprep.subr.mxu1 %v4536_v1 }
 0x56a   : > { %v3908_v63 = vpop.eup %3907 }
 0x56b   : > { %v1610_v2 = vmul.f32 %v3908_v63, %v3900_v46  ;;  %v1813_v46 = vld [vmem:[%s5685_s6 + $0x10] sm:$0xff]  ;;  %v3360_v63 = vld [vmem:[#allocation11] ss:$0 sm:$0xff]  ;;  %s5699_s6 = sand.u32 1, %s5668_s28  }
 0x56c   : > { %v3651_v48 = vpack.c.bf16 %v1814_v47, %v1813_v46 }
 0x56d   : > { %3354 = vst.msk [vmem:[%s5206_s1 + $0x18] sm:$0xff] %vm1011_vm2, %v1610_v2 }
 0x588   : > { %v1435_v3 = vpop.xlane.xlu0 %1434 }
 0x589   : > { %3909 = vrcp.f32 %v1435_v3 }
 0x58c   : > { %v1614_v6 = vpop.permute.xlu0 %1613 }
 0x593   : > { %v3910_v4 = vpop.eup %3909 }
 0x594   : > { %v1437_v5 = vmul.f32 %v3910_v4, %v3902_v51 }
 0x596   : > { %3350 = vst.msk [vmem:[%s5206_s1 + $0x10] sm:$0xff] %vm1011_vm2, %v1437_v5  ;;  %3509 = vmatmul.mubr.msk.f32.vlgmr.msra.gmra.mrb[8].mxu1 %vm1011_vm2, %v1437_v5 }
 0x597   : > { %3517 = vmatpush3.msra.mxu1 %v1614_v6  ;;  %3518 = vmatprep.mubr.msk.f32.mxu1 %vm4535_vm0, %v4536_v1 }
 0x598   : > { %3647 = vmatprep.subr.bf16.mxu1 %v4534_v0 }
 0x59a   : > { %3519 = vmatmul.mubr.msk.f32.vlgmr.msra.gmra.mrb[10].mxu1 %vm1011_vm2, %v1610_v2 }
 0x59b   : > { %3540 = vmatprep.mubr.msk.f32.mxu1 %vm4535_vm0, %v4536_v1  ;;  %3649 = vmatpush3.bf16.msra.mxu1 %v3648_v45 }
 0x59c   : > { %3650 = vmatprep.subr.bf16.mxu1 %v4534_v0 }
 0x59f   : > { %3652 = vmatpush3.bf16.msra.mxu1 %v3651_v48 }
 0x5a0   : > { %3554 = vmatprep.subr.mxu1 %v4536_v1 }
 0x634   : > { %v1171_v7 = vpop.f32.mrb[4].mxu1 }
 0x635   : > { %1175 = vst.msk [vmem:[#allocation2] sm:$0xff] %vm1011_vm2, %v1171_v7  ;;  %v3490_v9 = vpop.f32.mrb[5].mxu1 }
 0x638   : > { %v1339_v10 = vpop.f32.mrb[6].mxu1 }
 0x639   : > { %1344 = vrot.lane.b32.xlu1 %v1339_v10, %s5610_s7  ;;  %v3500_v11 = vpop.f32.mrb[7].mxu1 }
 0x669   : > { %v1512_v18 = vpop.f32.mrb[8].mxu1 }
 0x66a   : > { %1517 = vrot.lane.b32.xlu0 %v1512_v18, %s5609_s4  ;;  %v3510_v19 = vpop.f32.mrb[9].mxu1  ;;  %s5686_s4 = smov 112  }
 0x66d   : > { %v1685_v20 = vpop.f32.mrb[10].mxu1 }
 0x66e   : > { %1690 = vrot.lane.b32.xlu1 %v1685_v20, %s5608_s12  ;;  %v3520_v21 = vpop.f32.mrb[11].mxu1  ;;  %s5687_s12 = smov 104  }
 0x6ab   : > { %v1345_v22 = vpop.permute.xlu1 %1344 }
 0x6ac   : > { %1348 = vst.msk [vmem:[#allocation2] sm:$0xff] %vm1347_vm3, %v1345_v22 }
 0x6dc   : > { %v1518_v23 = vpop.permute.xlu0 %1517 }
 0x6dd   : > { %1521 = vst.msk [vmem:[#allocation2] sm:$0xff] %vm1520_vm4, %v1518_v23 }
 0x6e0   : > { %v1691_v24 = vpop.permute.xlu1 %1690 }
 0x6e1   : > { %1694 = vst.msk [vmem:[#allocation2] sm:$0xff] %vm1693_vm5, %v1691_v24 }
 0x6e8   : > { %v1695_v25 = vld [vmem:[#allocation2] sm:$0xff] }
 0x6e9   : > { %3530 = vmatmul.mubr.msk.f32.vlgmr.msra.gmra.mrb[6].mxu0 %vm933_vm1, %v1695_v25 }
 0x6ea   : > { %3551 = vmatprep.mubr.msk.f32.mxu0 %vm4535_vm0, %v4536_v1  ;;  %3655 = vmatpush3.bf16.msra.mxu0 %v3654_v39 }
 0x6eb   : > { %3656 = vmatprep.subr.bf16.mxu0 %v4534_v0 }
 0x7bc   : > { %v1776_v27 = vpop.f32.mrb[6].mxu0 }
 0x7bd   : > { %v1777_v28 = vadd.f32 %v3356_v26, %v1776_v27  ;;  %v3531_v29 = vpop.f32.mrb[7].mxu0 }
 0x7bf   : > { %v1780_v30 = vadd.f32 %v1777_v28, %v5149_v8  ;;  %v3657_v8 = vpack.c.bf16 %v1898_v41, %v1897_v40 }
 0x7c1   : > { %v1781_v31 = vsel %vm933_vm1, %v1780_v30, 0.0  ;;  %3658 = vmatpush3.bf16.msra.mxu0 %v3657_v8 }
 0x7c2   : > { %1782 = vadd.xlane.f32.xlu0 %v1781_v31  ;;  %3564 = vmatprep.subr.mxu0 %v4536_v1 }
 0x7c4   : > { %3552 = vmatmul.mubr.msk.f32.vlgmr.msra.gmra.mrb[8].mxu0 %vm933_vm1, %v921_v42 }
 0x7c5   : > { %3566 = vmatprep.mubr.msk.f32.mxu0 %vm4535_vm0, %v4536_v1 }
 0x84f   : > { %v1783_v32 = vpop.xlane.xlu0 %1782 }
 0x850   : > { %v1785_v33 = vmul.f32 0.03125, %v1783_v32 }
 0x852   : > { %v1786_v34 = vsub.f32 %v1780_v30, %v1785_v33 }
 0x854   : > { %v1787_v35 = vmul.f32 %v1786_v34, %v1786_v34 }
 0x856   : > { %v1788_v36 = vsel %vm933_vm1, %v1787_v35, 0.0 }
 0x857   : > { %1789 = vadd.xlane.f32.xlu1 %v1788_v36 }
 0x897   : > { %v1975_v59 = vpop.f32.mrb[8].mxu0 }
 0x898   : > { %v5285_v60 = vadd.f32 %v3362_v58, %v1975_v59  ;;  %v3553_v61 = vpop.f32.mrb[9].mxu0 }
 0x89a   : > { %2147 = vrot.lane.b32.xlu0 %v5285_v60, %s4538_s8 }
 0x89e   : > { %2319 = vrot.lane.b32.xlu0 %v5285_v60, %s5686_s4 }
 0x8a2   : > { %2491 = vrot.lane.b32.xlu0 %v5285_v60, %s5687_s12 }
 0x8e4   : > { %v1790_v49 = vpop.xlane.xlu1 %1789 }
 0x8e5   : > { %v1791_v50 = vmul.f32 0.03125, %v1790_v49 }
 0x8e7   : > { %v1792_v51 = vadd.f32 1e-05, %v1791_v50 }
 0x8e9   : > { %3911 = vrsqrt.f32 %v1792_v51 }
 0x8f3   : > { %v3912_v52 = vpop.eup %3911 }
 0x8f4   : > { %v1794_v54 = vmul.f32 %v3912_v52, %v1786_v34 }
 0x8f6   : > { %v1802_v56 = vmul.f32 %v3358_v53, %v1794_v54 }
 0x8f8   : > { %v5279_v57 = vadd.f32 %v3359_v55, %v1802_v56 }
 0x8fa   : > { %3541 = vmatmul.mubr.msk.f32.vlgmr.msra.gmra.mrb[12].mxu1 %vm933_vm1, %v5279_v57 }
 0x8fb   : > { %3556 = vmatprep.mubr.msk.f32.mxu1 %vm4535_vm0, %v4536_v1  ;;  %3555 = vmatpush3.xpose.msk.msra.mxu1 %vm1011_vm2, %v5285_v60 }
 0x8fc   : > { %3559 = vmatprep.subr.mxu1 %v4536_v1 }
 0x90c   : > { %v2148_v62 = vpop.permute.xlu0 %2147 }
 0x90d   : > { %3565 = vmatpush3.xpose.msk.msra.mxu0 %vm1011_vm2, %v2148_v62 }
 0x90e   : > { %3574 = vmatprep.subr.mxu0 %v4536_v1 }
 0x910   : > { %v2320_v6 = vpop.permute.xlu0 %2319 }
 0x914   : > { %v2492_v10 = vpop.permute.xlu0 %2491 }
 0x9cd   : > { %v1891_v2 = vpop.f32.mrb[12].mxu1 }
 0x9ce   : > { %v1892_v3 = vadd.f32 %v3360_v63, %v1891_v2  ;;  %v3542_v4 = vpop.f32.mrb[13].mxu1 }
 0x9d0   : > { %v1979_v5 = vmul.f32 0.35355338, %v1892_v3 }
 0x9d2   : > { %2145 = vrot.lane.b32.xlu1 %v1979_v5, %s4538_s8  ;;  %3557 = vmatmul.mubr.msk.f32.vlgmr.msra.gmra.mrb[14].mxu1 %vm1011_vm2, %v1979_v5  ;;  %s5688_s8 = smov 96  }
 0x9d3   : > { %3561 = vmatprep.mubr.msk.f32.mxu1 %vm4535_vm0, %v4536_v1 }
 0x9d6   : > { %2317 = vrot.lane.b32.xlu1 %v1979_v5, %s5686_s4  ;;  %s5695_s4 = smov 16  }
 0x9da   : > { %2489 = vrot.lane.b32.xlu1 %v1979_v5, %s5687_s12  ;;  %s5693_s12 = sld [smem:[#allocation56_spill]] }
 0x9e0   : > { %v2662_v62 = vld [vmem:[%s5693_s12] sm:$0xff]  ;;  %v2663_v63 = vld [vmem:[%s5693_s12 + $0x8] sm:$0xff]  ;;  %v2664_v3 = vld [vmem:[%s5693_s12 + $0x10] sm:$0xff] }
 0x9e1   : > { %v3660_v2 = vpack.c.bf16 %v2663_v63, %v2662_v62  ;;  %v2665_v4 = vld [vmem:[%s5693_s12 + $0x18] sm:$0xff]  ;;  %s5436_s12 = scalar_lea.sflag [#allocation29], %s5699_s6 }
 0x9e2   : > { %v3663_v5 = vpack.c.bf16 %v2665_v4, %v2664_v3 }
 0xa44   : > { %v2146_v7 = vpop.permute.xlu1 %2145 }
 0xa45   : > { %3567 = vmatmul.mubr.msk.f32.vlgmr.msra.gmra.mrb[10].mxu0 %vm1011_vm2, %v2146_v7 }
 0xa46   : > { %3575 = vmatpush3.xpose.msk.msra.mxu0 %vm1011_vm2, %v2320_v6  ;;  %3576 = vmatprep.mubr.msk.f32.mxu0 %vm4535_vm0, %v4536_v1 }
 0xa47   : > { %3584 = vmatprep.subr.mxu0 %v4536_v1 }
 0xa48   : > { %v2318_v9 = vpop.permute.xlu1 %2317 }
 0xa49   : > { %3577 = vmatmul.mubr.msk.f32.vlgmr.msra.gmra.mrb[12].mxu0 %vm1011_vm2, %v2318_v9 }
 0xa4a   : > { %3585 = vmatpush3.xpose.msk.msra.mxu0 %vm1011_vm2, %v2492_v10  ;;  %3586 = vmatprep.mubr.msk.f32.mxu0 %vm4535_vm0, %v4536_v1 }
 0xa4b   : > { %3659 = vmatprep.subr.bf16.mxu0 %v4534_v0 }
 0xa4c   : > { %v2490_v11 = vpop.permute.xlu1 %2489 }
 0xa4d   : > { %3587 = vmatmul.mubr.msk.f32.vlgmr.msra.gmra.mrb[14].mxu0 %vm1011_vm2, %v2490_v11 }
 0xa4e   : > { %3602 = vmatprep.mubr.msk.f32.mxu0 %vm4535_vm0, %v4536_v1  ;;  %3661 = vmatpush3.bf16.msra.mxu0 %v3660_v2 }
 0xa4f   : > { %3662 = vmatprep.subr.bf16.mxu0 %v4534_v0 }
 0xa52   : > { %3664 = vmatpush3.bf16.msra.mxu0 %v3663_v5 }
 0xa53   : > { %3671 = vmatprep.subr.bf16.mxu0 %v4534_v0 }
 0xaa5   : > { %v2052_v12 = vpop.f32.mrb[14].mxu1 }
 0xaa6   : > { %v3558_v13 = vpop.f32.mrb[15].mxu1  ;;  %v2056_v14 = vsel %vm1011_vm2, %v2052_v12, -inf }
 0xaa7   : > { %2057 = vmax.xlane.f32.xlu0 %v2056_v14 }
 0xb18   : > { %v2219_v15 = vpop.f32.mrb[10].mxu0 }
 0xb19   : > { %v3568_v16 = vpop.f32.mrb[11].mxu0  ;;  %v2223_v17 = vsel %vm1011_vm2, %v2219_v15, -inf }
 0xb1a   : > { %2224 = vmax.xlane.f32.xlu1 %v2223_v17  ;;  %v3379_v17 = vld [vmem:[#allocation15] ss:$0 sm:$0xff] }
 0xb1c   : > { %v2391_v18 = vpop.f32.mrb[12].mxu0 }
 0xb1d   : > { %v3578_v19 = vpop.f32.mrb[13].mxu0  ;;  %v2395_v20 = vsel %vm1011_vm2, %v2391_v18, -inf }
 0xb1e   : > { %2396 = vmax.xlane.f32.xlu0 %v2395_v20 }
 0xb20   : > { %v2563_v21 = vpop.f32.mrb[14].mxu0 }
 0xb21   : > { %v3588_v22 = vpop.f32.mrb[15].mxu0  ;;  %v2567_v23 = vsel %vm1011_vm2, %v2563_v21, -inf }
 0xb22   : > { %2568 = vmax.xlane.f32.xlu0 %v2567_v23 }
 0xb2b   : > { %2068 = vrot.lane.b32.xlu1 %v5285_v60, %s5688_s8  ;;  %s5696_s8 = smov 24  }
 0xb34   : > { %v2058_v24 = vpop.xlane.xlu0 %2057 }
 0xb35   : > { %v2059_v25 = vsub.f32 %v2052_v12, %v2058_v24 }
 0xb37   : > { %v2060_v26 = vmul.f32 1.442695, %v2059_v25 }
 0xb39   : > { %3913 = vpow2.f32 %v2060_v26 }
 0xb43   : > { %v3914_v27 = vpop.eup %3913 }
 0xb44   : > { %v2062_v28 = vsel %vm1011_vm2, %v3914_v27, 0.0 }
 0xb4f   : > { %2063 = vadd.xlane.f32.xlu1 %v2062_v28  ;;  %v2776_v28 = vld [vmem:[#allocation26] sm:$0xff] }
 0xba7   : > { %v2225_v29 = vpop.xlane.xlu1 %2224 }
 0xba8   : > { %v2226_v30 = vsub.f32 %v2219_v15, %v2225_v29  ;;  %v2777_v29 = vld [vmem:[#allocation26 + $0x8] sm:$0xff] }
 0xbaa   : > { %v2227_v31 = vmul.f32 1.442695, %v2226_v30  ;;  %v3666_v30 = vpack.c.bf16 %v2777_v29, %v2776_v28 }
 0xbab   : > { %v2069_v32 = vpop.permute.xlu1 %2068  ;;  %v2397_v33 = vpop.xlane.xlu0 %2396 }
 0xbac   : > { %3915 = vpow2.f32 %v2227_v31  ;;  %v2398_v34 = vsub.f32 %v2391_v18, %v2397_v33  ;;  %3560 = vmatpush3.msra.mxu1 %v2069_v32  ;;  %v2779_v31 = vld [vmem:[#allocation26 + $0x18] sm:$0xff] }
 0xbad   : > { %3569 = vmatprep.subr.mxu1 %v4536_v1 }
 0xbae   : > { %v2399_v35 = vmul.f32 1.442695, %v2398_v34 }
 0xbaf   : > { %v2569_v36 = vpop.xlane.xlu0 %2568 }
 0xbb0   : > { %3917 = vpow2.f32 %v2399_v35  ;;  %v2570_v37 = vsub.f32 %v2563_v21, %v2569_v36 }
 0xbb2   : > { %v2571_v38 = vmul.f32 1.442695, %v2570_v37 }
 0xbb4   : > { %3919 = vpow2.f32 %v2571_v38 }
 0xbb6   : > { %v3916_v39 = vpop.eup %3915 }
 0xbb7   : > { %v2229_v40 = vsel %vm1011_vm2, %v3916_v39, 0.0 }
 0xbb8   : > { %2230 = vadd.xlane.f32.xlu0 %v2229_v40 }
 0xbba   : > { %v3918_v41 = vpop.eup %3917 }
 0xbbb   : > { %v2401_v8 = vsel %vm1011_vm2, %v3918_v41, 0.0 }
 0xbbc   : > { %2402 = vadd.xlane.f32.xlu1 %v2401_v8 }
 0xbbe   : > { %v3920_v42 = vpop.eup %3919 }
 0xbbf   : > { %v2573_v43 = vsel %vm1011_vm2, %v3920_v42, 0.0 }
 0xbc0   : > { %2574 = vadd.xlane.f32.xlu0 %v2573_v43 }
 0xbcd   : > { %2408 = vrot.lane.b32.xlu1 %v5285_v60, %s5689_s10  ;;  %s5698_s10 = sld [smem:[#allocation64_spill]] }
 0xbd1   : > { %2580 = vrot.lane.b32.xlu1 %v5285_v60, %s5690_s24  ;;  %s5697_s24 = sld [smem:[#allocation62_spill]] }
 0xbd6   : > { %2236 = vrot.lane.b32.xlu0 %v5285_v60, %s5691_s2 }
 0xbd7   : > { %v2855_v33 = vld [vmem:[%s5697_s24 + $0x8] sm:$0xff]  ;;  %v2856_v34 = vld [vmem:[%s5697_s24 + $0x10] sm:$0xff]  ;;  %v2857_v36 = vld [vmem:[%s5697_s24 + $0x18] sm:$0xff] }
 0xbd8   : > { %v3675_v37 = vpack.c.bf16 %v2857_v36, %v2856_v34  ;;  %v2858_v38 = vld [vmem:[%s5697_s24 + $0x20] sm:$0xff] }
 0xbdc   : > { %v2064_v44 = vpop.xlane.xlu1 %2063 }
 0xbdd   : > { %3921 = vrcp.f32 %v2064_v44  ;;  %v3381_v44 = vld [vmem:[#allocation20] ss:$0 sm:$0xff] }
 0xbe7   : > { %v3922_v45 = vpop.eup %3921 }
 0xbe8   : > { %v2066_v46 = vmul.f32 %v3922_v45, %v3914_v27 }
 0xbea   : > { %2067 = vst.msk [vmem:[%s5336_s9] sm:$0xff] %vm1011_vm2, %v2066_v46  ;;  %3562 = vmatmul.mubr.msk.f32.vlgmr.msra.gmra.mrb[16].mxu1 %vm1011_vm2, %v2066_v46  ;;  %v3382_v46 = vld [vmem:[#allocation21] ss:$0 sm:$0xff] }
 0xbeb   : > { %3571 = vmatprep.mubr.msk.f32.mxu1 %vm4535_vm0, %v4536_v1 }
 0xc45   : > { %v2231_v47 = vpop.xlane.xlu0 %2230 }
 0xc46   : > { %3923 = vrcp.f32 %v2231_v47 }
 0xc49   : > { %v2403_v48 = vpop.xlane.xlu1 %2402 }
 0xc4a   : > { %3925 = vrcp.f32 %v2403_v48 }
 0xc4d   : > { %v2575_v49 = vpop.xlane.xlu0 %2574  ;;  %v2409_v52 = vpop.permute.xlu1 %2408 }
 0xc4e   : > { %3927 = vrcp.f32 %v2575_v49  ;;  %v2860_v49 = vld [vmem:[%s5697_s24 + $0x30] sm:$0xff] }
 0xc50   : > { %v3924_v50 = vpop.eup %3923 }
 0xc51   : > { %v2233_v51 = vmul.f32 %v3924_v50, %v3916_v39  ;;  %v2237_v53 = vpop.permute.xlu0 %2236  ;;  %v2581_v56 = vpop.permute.xlu1 %2580  ;;  %v2859_v39 = vld [vmem:[%s5697_s24 + $0x28] sm:$0xff] }
 0xc52   : > { %3570 = vmatpush3.msra.mxu1 %v2237_v53  ;;  %v3678_v40 = vpack.c.bf16 %v2859_v39, %v2858_v38 }
 0xc53   : > { %3369 = vst.msk [vmem:[%s5336_s9 + $0x8] sm:$0xff] %vm1011_vm2, %v2233_v51  ;;  %3572 = vmatmul.mubr.msk.f32.vlgmr.msra.gmra.mrb[18].mxu1 %vm1011_vm2, %v2233_v51  ;;  %3579 = vmatprep.subr.mxu1 %v4536_v1 }
 0xc54   : > { %v3926_v54 = vpop.eup %3925  ;;  %3580 = vmatpush3.msra.mxu1 %v2409_v52  ;;  %3581 = vmatprep.mubr.msk.f32.mxu1 %vm4535_vm0, %v4536_v1 }
 0xc55   : > { %v2405_v55 = vmul.f32 %v3926_v54, %v3918_v41  ;;  %3589 = vmatprep.subr.mxu1 %v4536_v1 }
 0xc57   : > { %3373 = vst.msk [vmem:[%s5336_s9 + $0x10] sm:$0xff] %vm1011_vm2, %v2405_v55  ;;  %3582 = vmatmul.mubr.msk.f32.vlgmr.msra.gmra.mrb[20].mxu1 %vm1011_vm2, %v2405_v55 }
 0xc58   : > { %v3928_v58 = vpop.eup %3927  ;;  %3590 = vmatpush3.msra.mxu1 %v2581_v56  ;;  %3591 = vmatprep.mubr.msk.f32.mxu1 %vm4535_vm0, %v4536_v1 }
 0xc59   : > { %v2577_v59 = vmul.f32 %v3928_v58, %v3920_v42  ;;  %3665 = vmatprep.subr.bf16.mxu1 %v4534_v0 }
 0xc5b   : > { %3377 = vst.msk [vmem:[%s5336_s9 + $0x18] sm:$0xff] %vm1011_vm2, %v2577_v59  ;;  %3592 = vmatmul.mubr.msk.f32.vlgmr.msra.gmra.mrb[22].mxu1 %vm1011_vm2, %v2577_v59 }
 0xc5c   : > { %3613 = vmatprep.mubr.msk.f32.mxu1 %vm4535_vm0, %v4536_v1  ;;  %3667 = vmatpush3.bf16.msra.mxu1 %v3666_v30 }
 0xc5d   : > { %3668 = vmatprep.subr.bf16.mxu1 %v4534_v0 }
 0xcbd   : > { %v2140_v60 = vpop.f32.mrb[16].mxu1 }
 0xcbe   : > { %2144 = vst.msk [vmem:[#allocation2] sm:$0xff] %vm1011_vm2, %v2140_v60  ;;  %v3563_v61 = vpop.f32.mrb[17].mxu1 }
 0xd26   : > { %v2308_v6 = vpop.f32.mrb[18].mxu1 }
 0xd27   : > { %2313 = vrot.lane.b32.xlu0 %v2308_v6, %s5694_s3  ;;  %v3573_v7 = vpop.f32.mrb[19].mxu1 }
 0xd2a   : > { %v2480_v9 = vpop.f32.mrb[20].mxu1 }
 0xd2b   : > { %2485 = vrot.lane.b32.xlu1 %v2480_v9, %s5695_s4  ;;  %v3583_v10 = vpop.f32.mrb[21].mxu1  ;;  %s5615_s4 = sshll.u32 %s5668_s28, 9 }
 0xd2c   : > { %s5429_s2 = scalar_lea.hbm %s5698_s10, %s5615_s4 }
 0xd2e   : > { %v2652_v11 = vpop.f32.mrb[22].mxu1 }
 0xd2f   : > { %2657 = vrot.lane.b32.xlu0 %v2652_v11, %s5696_s8  ;;  %v3593_v12 = vpop.f32.mrb[23].mxu1  ;;  %s4363_s8 = scalar_lea.vmem %s4362_s14, 1024 }
 0xd30   : > { %p4365_p1 = scmp.lt.s32.totalorder %s4363_s8, %s4357_s20 }
 0xd32   : > { %p4366_p3 = por %p4365_p1, %p4364_p13 }
 0xd34   : > { %p4367_p2 = pnand %p4366_p3, %p4360_p4 }
 0xd99   : > { %v2314_v13 = vpop.permute.xlu0 %2313 }
 0xd9a   : > { %2316 = vst.msk [vmem:[#allocation2] sm:$0xff] %vm1347_vm3, %v2314_v13 }
 0xd9d   : > { %v2486_v14 = vpop.permute.xlu1 %2485 }
 0xd9e   : > { %2488 = vst.msk [vmem:[#allocation2] sm:$0xff] %vm1520_vm4, %v2486_v14 }
 0xda1   : > { %v2658_v15 = vpop.permute.xlu0 %2657 }
 0xda2   : > { %2660 = vst.msk [vmem:[#allocation2] sm:$0xff] %vm1693_vm5, %v2658_v15 }
 0xda9   : > { %v2661_v16 = vld [vmem:[#allocation2] sm:$0xff] }
 0xdaa   : > { %3603 = vmatmul.mubr.msk.f32.vlgmr.msra.gmra.mrb[16].mxu0 %vm933_vm1, %v2661_v16 }
 0xdab   : > { %3632 = vmatprep.mubr.msk.f32.mxu0 %vm4535_vm0, %v4536_v1  ;;  %v2778_v1 = vld [vmem:[#allocation26 + $0x10] sm:$0xff] }
 0xdac   : > { %v3669_v32 = vpack.c.bf16 %v2779_v31, %v2778_v1 }
 0xdae   : > { %3670 = vmatpush3.bf16.msra.mxu1 %v3669_v32 }
 0xe7d   : > { %v2742_v18 = vpop.f32.mrb[16].mxu0 }
 0xe7e   : > { %v2743_v19 = vadd.f32 %v3379_v17, %v2742_v18  ;;  %v3604_v20 = vpop.f32.mrb[17].mxu0 }
 0xe80   : > { %v2746_v21 = vadd.f32 %v2743_v19, %v5279_v57  ;;  %v2854_v57 = vld [vmem:[%s5697_s24] sm:$0xff] }
 0xe81   : > { %v3672_v35 = vpack.c.bf16 %v2855_v33, %v2854_v57 }
 0xe82   : > { %v2747_v22 = vsel %vm933_vm1, %v2746_v21, 0.0 }
 0xe83   : > { %2748 = vadd.xlane.f32.xlu1 %v2747_v22  ;;  %3673 = vmatpush3.bf16.msra.mxu0 %v3672_v35 }
 0xe84   : > { %3674 = vmatprep.subr.bf16.mxu0 %v4534_v0 }
 0xe87   : > { %3676 = vmatpush3.bf16.msra.mxu0 %v3675_v37 }
 0xe88   : > { %3677 = vmatprep.subr.bf16.mxu0 %v4534_v0 }
 0xe8b   : > { %3679 = vmatpush3.bf16.msra.mxu0 %v3678_v40 }
 0xe8c   : > { %3680 = vmatprep.subr.bf16.mxu0 %v4534_v0  ;;  %v2861_v0 = vld [vmem:[%s5697_s24 + $0x38] sm:$0xff] }
 0xe8d   : > { %v3681_v50 = vpack.c.bf16 %v2861_v0, %v2860_v49 }
 0xe8f   : > { %3682 = vmatpush3.bf16.msra.mxu0 %v3681_v50 }
 0xf10   : > { %v2749_v23 = vpop.xlane.xlu1 %2748 }
 0xf11   : > { %v2750_v24 = vmul.f32 0.03125, %v2749_v23 }
 0xf13   : > { %v2751_v25 = vsub.f32 %v2746_v21, %v2750_v24 }
 0xf15   : > { %v2752_v26 = vmul.f32 %v2751_v25, %v2751_v25 }
 0xf17   : > { %v2753_v27 = vsel %vm933_vm1, %v2752_v26, 0.0 }
 0xf18   : > { %2754 = vadd.xlane.f32.xlu0 %v2753_v27 }
 0xfa5   : > { %v2755_v41 = vpop.xlane.xlu0 %2754 }
 0xfa6   : > { %v2756_v8 = vmul.f32 0.03125, %v2755_v41 }
 0xfa8   : > { %v2757_v42 = vadd.f32 1e-05, %v2756_v8 }
 0xfaa   : > { %3929 = vrsqrt.f32 %v2757_v42 }
 0xfb4   : > { %v3930_v43 = vpop.eup %3929 }
 0xfb5   : > { %v2759_v45 = vmul.f32 %v3930_v43, %v2751_v25 }
 0xfb7   : > { %v2767_v47 = vmul.f32 %v3381_v44, %v2759_v45 }
 0xfb9   : > { %v2775_v48 = vadd.f32 %v3382_v46, %v2767_v47 }
 0xfbb   : > { %3614 = vmatmul.mubr.msk.f32.vlgmr.msra.gmra.mrb[24].mxu1 %vm933_vm1, %v2775_v48 }
0x108e   : > { %v2849_v51 = vpop.f32.mrb[24].mxu1 }
0x108f   : > { %v2853_v52 = vmax.f32 %v2849_v51, 0.0  ;;  %v3615_v53 = vpop.f32.mrb[25].mxu1 }
0x1091   : > { %3633 = vmatmul.mubr.msk.f32.vlgmr.msra.gmra.mrb[18].mxu0 %vm2862_vm6, %v2853_v52 }
0x1164   : > { %v2932_v54 = vpop.f32.mrb[18].mxu0 }
0x1165   : > { %v2936_v55 = vadd.f32 %v2932_v54, %v2775_v48  ;;  %v3634_v56 = vpop.f32.mrb[19].mxu0 }
0x1167   : > { %v2937_v58 = vsel %vm933_vm1, %v2936_v55, 0.0 }
0x1168   : > { %2938 = vadd.xlane.f32.xlu0 %v2937_v58 }
0x11f5   : > { %v2939_v59 = vpop.xlane.xlu0 %2938 }
0x11f6   : > { %v2940_v60 = vmul.f32 0.03125, %v2939_v59 }
0x11f8   : > { %v5418_v61 = vsub.f32 %v2936_v55, %v2940_v60 }
0x11fa   : > { %v2942_v62 = vmul.f32 %v5418_v61, %v5418_v61 }
0x11fc   : > { %v2943_v63 = vsel %vm933_vm1, %v2942_v62, 0.0 }
0x11fd   : > { %2944 = vadd.xlane.f32.xlu1 %v2943_v63 }
0x11fe   : > { %4370 = shalt.err (!%p4367_p2)
}
0x11ff   : > { %s4371_s1 = scalar_lea.hbm %s5429_s2, 512  ;;  %s4375_s13 = scalar_lea.hbm %s5698_s10, 1024 }
0x1200   : > { %p4372_p6 = scmp.ne.s32.totalorder %s5429_s2, %s4371_s1  ;;  %p4376_p9 = scmp.lt.u32.totalorder %s5429_s2, %s5698_s10 }
0x1201   : > { %p4377_p0 = scmp.lt.u32.totalorder %s4375_s13, %s4371_s1  ;;  %p4379_p12 = scmp.lt.u32.totalorder %s4371_s1, %s5429_s2 }
0x1202   : > { %p4373_p11 = pnand %p4372_p6, %p5700_p8 }
0x1203   : > { %p4378_p7 = por %p4377_p0, %p4376_p9 }
0x1204   : > { %p4374_p5 = pneg %p4373_p11 }
0x1205   : > { %p4380_p10 = por %p4379_p12, %p4378_p7 }
0x1207   : > { %p4381_p4 = pnand %p4380_p10, %p4374_p5 }
0x1209   : > { %4384 = shalt.err (!%p4381_p4)
}
0x120a   : > { %s4552_s20 = smov 128   ;;  %s5701_s4 = sshll.u32 %s5668_s28, 9 }
0x120b   : > { %3740 = dma.vmem_to_hbm [thread:$0]  (%p5700_p8), %s5432_s11, 512, %s5429_s2, %s5436_s12, %s4552_s20, %s4552_s20, %s5694_s3  }
0x120c   : > { %s5702_s1 = sld [smem:[#allocation65_spill]]  ;;  %s3020_s13 = sshll.u32 %s5336_s9, 4  ;;  %s5471_s13 = int_to_ptr.vmem [resolvable:$true] %s3020_s13 }
0x120d   : > { %s4385_s14 = scalar_lea.vmem %s5471_s13, 512  ;;  %s4553_s10 = smov [#allocation30]  }
0x120e   : > { %p4386_p13 = scmp.ne.s32.totalorder %s5471_s13, %s4385_s14  ;;  %s4389_s15 = sshll.u32 %s4553_s10, 4  ;;  %s4390_s15 = int_to_ptr.vmem [resolvable:$false] %s4389_s15 }
0x120f   : > { %s4391_s2 = scalar_lea.vmem %s4390_s15, 1024  ;;  %p4392_p2 = scmp.lt.s32.totalorder %s5471_s13, %s4390_s15 }
0x1210   : > { %p4387_p1 = pnand %p4386_p13, %p5700_p8  ;;  %p4393_p6 = scmp.lt.s32.totalorder %s4391_s2, %s4385_s14 }
0x1212   : > { %s5468_s6 = scalar_lea.hbm %s5702_s1, %s5701_s4  ;;  %p4388_p3 = pneg %p4387_p1 }
0x1213   : > { %p4394_p11 = por %p4393_p6, %p4392_p2 }
0x1215   : > { %p4395_p5 = pnand %p4394_p11, %p4388_p3 }
0x1217   : > { %4398 = shalt.err (!%p4395_p5)
}
0x1218   : > { %s4399_s9 = scalar_lea.hbm %s5468_s6, 512  ;;  %s4403_s10 = scalar_lea.hbm %s5702_s1, 1024 }
0x1219   : > { %p4400_p9 = scmp.ne.s32.totalorder %s5468_s6, %s4399_s9  ;;  %p4404_p12 = scmp.lt.u32.totalorder %s5468_s6, %s5702_s1 }
0x121a   : > { %p4405_p10 = scmp.lt.u32.totalorder %s4403_s10, %s4399_s9  ;;  %p4407_p13 = scmp.lt.u32.totalorder %s4399_s9, %s5468_s6 }
0x121b   : > { %p4401_p0 = pnand %p4400_p9, %p5700_p8 }
0x121c   : > { %p4406_p4 = por %p4405_p10, %p4404_p12 }
0x121d   : > { %p4402_p7 = pneg %p4401_p0 }
0x121e   : > { %p4408_p1 = por %p4407_p13, %p4406_p4 }
0x1220   : > { %p4409_p3 = pnand %p4408_p1, %p4402_p7 }
0x1222   : > { %4412 = shalt.err (!%p4409_p3)
}
0x1223   : > { %3741 = dma.vmem_to_hbm [thread:$0]  (%p5700_p8), %s5471_s13, 512, %s5468_s6, %s5436_s12, %s4552_s20, %s4552_s20, %s5694_s3   ;;  %v3385_v6 = vld [vmem:[#allocation23] ss:$0 sm:$0xff]  ;;  %v3386_v9 = vld [vmem:[#allocation24] ss:$0 sm:$0xff] }
0x1224   : > { %s3390_s7 = sshll.u32 %s5668_s28, 7  ;;  %s905_s14 = scalar_lea.vmem [#allocation27], %s5084_s5 }
0x1225   : > { %s2991_s2 = sshll.u32 %s905_s14, 4  ;;  %s5703_s4 = sld [smem:[#allocation63_spill]]  ;;  %s5506_s2 = int_to_ptr.vmem [resolvable:$true] %s2991_s2 }
0x1226   : > { %s2968_s12 = scalar_lea.sflag [#allocation5], %s5081_s22  ;;  %s4413_s20 = scalar_lea.vmem %s5506_s2, 128 }
0x1227   : > { %p4414_p2 = scmp.ne.s32.totalorder %s5506_s2, %s4413_s20  ;;  %s4554_s5 = smov [#allocation27]  }
0x1228   : > { %s4417_s28 = sshll.u32 %s4554_s5, 4  ;;  %s4418_s28 = int_to_ptr.vmem [resolvable:$false] %s4417_s28 }
0x1229   : > { %p4415_p6 = pnand %p4414_p2, %p5700_p8  ;;  %s4419_s6 = scalar_lea.vmem %s4418_s28, 256 }
0x122a   : > { %p4420_p5 = scmp.lt.s32.totalorder %s5506_s2, %s4418_s28  ;;  %p4421_p9 = scmp.lt.s32.totalorder %s4419_s6, %s4413_s20 }
0x122b   : > { %s5504_s3 = scalar_lea.hbm %s5703_s4, %s3390_s7  ;;  %p4416_p11 = pneg %p4415_p6 }
0x122c   : > { %p4422_p0 = por %p4421_p9, %p4420_p5 }
0x122e   : > { %p4423_p7 = pnand %p4422_p0, %p4416_p11 }
0x128a   : > { %v2945_v2 = vpop.xlane.xlu1 %2944 }
0x128b   : > { %v2946_v3 = vmul.f32 0.03125, %v2945_v2 }
0x128d   : > { %v2947_v4 = vadd.f32 1e-05, %v2946_v3 }
0x128f   : > { %3931 = vrsqrt.f32 %v2947_v4 }
0x1299   : > { %v3932_v5 = vpop.eup %3931 }
0x129a   : > { %v2949_v7 = vmul.f32 %v3932_v5, %v5418_v61 }
0x129c   : > { %v2957_v10 = vmul.f32 %v3385_v6, %v2949_v7 }
0x129e   : > { %v2965_v11 = vadd.f32 %v3386_v9, %v2957_v10 }
0x12a0   : > { %2966 = vst.msk [vmem:[%s905_s14] sm:$0xff] %vm933_vm1, %v2965_v11 }
0x12a1   : > { %4426 = shalt.err (!%p4423_p7)
}
0x12a2   : > { %s4427_s22 = scalar_lea.hbm %s5504_s3, 128  ;;  %s4431_s8 = scalar_lea.hbm %s5703_s4, 256 }
0x12a3   : > { %p4428_p12 = scmp.ne.s32.totalorder %s5504_s3, %s4427_s22  ;;  %p4432_p13 = scmp.lt.u32.totalorder %s5504_s3, %s5703_s4 }
0x12a4   : > { %p4433_p1 = scmp.lt.u32.totalorder %s4431_s8, %s4427_s22  ;;  %p4435_p2 = scmp.lt.u32.totalorder %s4427_s22, %s5504_s3 }
0x12a5   : > { %p4429_p10 = pnand %p4428_p12, %p5700_p8 }
0x12a6   : > { %p4434_p3 = por %p4433_p1, %p4432_p13 }
0x12a7   : > { %p4430_p4 = pneg %p4429_p10 }
0x12a8   : > { %p4436_p6 = por %p4435_p2, %p4434_p3 }
0x12aa   : > { %p4437_p11 = pnand %p4436_p6, %p4430_p4 }
0x12ac   : > { %4440 = shalt.err (!%p4437_p11)
}
0x12ad   : > { %3739 = dma.vmem_to_hbm [thread:$0]  (%p5700_p8), %s5506_s2, 128, %s5504_s3, %s2968_s12  }
0x12ae PF: > { %s5704_s14 = sld [smem:[#allocation42_spill]]  ;;  %p5705_p5 = scmp.ne.s32.totalorder %s5660_s27, 0 }
0x12af   : > { %p5706_p9 = scmp.ge.s32.totalorder %s4515_s30, 2 }
0x12b1   : > { %p3793_p0 = pnand %p5706_p9, %p5705_p5 }
0x12b4   : > { %s3035_s9 = sand.u32 1, %s5704_s14  }
0x12b5   : > { %s3036_s11 = scalar_lea.sflag [#allocation5], %s3035_s9 }
0x12b6   : > { %4494 = dma.done.wait (!%p3793_p0), %s3036_s11, 128  }
0x12b7   : > { %4496 = vsyncadd (!%p3793_p0), %s3036_s11, 4294967168  ;;  %s5707_s20 = sadd.s32 4294967294, %s4515_s30  }
0x12b8   : > { %s3044_s5 = sand.u32 1, %s5707_s20  }
0x12b9   : > { %s3045_s28 = scalar_lea.sflag [#allocation29], %s3044_s5 }
0x12ba   : > { %4498 = dma.done.wait (!%p3793_p0), %s3045_s28, 1024  }
0x12bb   : > { %4500 = vsyncadd (!%p3793_p0), %s3045_s28, 4294966272  ;;  %s5708_s3 = sld [smem:[#allocation43_spill]]  ;;  %p48_p8 = scmp.ge.s32.totalorder %s4980_s21, 4  }
0x12bc   : > { %s5709_s28 = smov %s4511_s29  ;;  %s5710_s29 = smov %s4992_s0 }
0x12bd   : > { %s5711_s30 = smov %s4980_s21  ;;  %50 = sbr.rel (!%p48_p8) target bundleno = 36 (0x24), region = 248 }
0x12c4   :  { %3059 = vsyncpa [#allocation4], 1 }
0x12c5   :  { %3061 = vsyncpa [#allocation4 + $0x1], 1 }
0x12c6   :  { %3062 = vsyncpa [#allocation7], 1 }
0x12c7   :  { %3064 = vsyncpa [#allocation7 + $0x1], 1 }
0x12c8   :  { %3065 = vsyncpa [#allocation10], 1 }
0x12c9   :  { %3066 = vsyncpa [#allocation13], 1 }
0x12ca   :  { %3067 = vsyncpa [#allocation16], 1 }
0x12cb   :  { %3068 = vsyncpa [#allocation19], 1 }
0x12cc   :  { %3069 = vsyncpa [#allocation22], 1 }
0x12cd   :  { %3070 = vsyncpa [#allocation25], 1 }
0x12ce   :  { %3071 = vsyncpa [#allocation5], 1 }
0x12cf   :  { %3073 = vsyncpa [#allocation5 + $0x1], 1 }
0x12d0   :  { %3074 = vsyncpa [#allocation29], 1 }
0x12d1   :  { %3076 = vsyncpa [#allocation29 + $0x1], 1 }

</bundles_post_ra>
